<compile_context>
chip_gen: v7x
topology: tpu7x:2x2x1
jax: 0.10.0
libtpu: 0.0.40
codegen_flags: <defaults>
</compile_context>

<pallas_src>
import functools

import jax
import jax.numpy as jnp
from jax.experimental import pallas as pl
from jax.experimental.pallas import tpu as pltpu


# ---------------------------------------------------------------------------
# Kernel 1: 1x1-conv projections theta / phi / g   (x is (C, TN), N lane-dense)
# ---------------------------------------------------------------------------
def _proj_kernel(x_ref, wt_ref, bt_ref, wp_ref, bp_ref, wg_ref, bg_ref,
                 th_ref, ph_ref, g_ref):
    x = x_ref[0].astype(jnp.float32)                     # (C, TN)

    def proj(w_ref, b_ref):
        # (Ci, C) @ (C, TN) + (Ci, 1)  ->  (Ci, TN)
        return jnp.dot(w_ref[...], x,
                       preferred_element_type=jnp.float32) + b_ref[...]

    th_ref[0] = proj(wt_ref, bt_ref).astype(th_ref.dtype)
    ph_ref[0] = proj(wp_ref, bp_ref).astype(ph_ref.dtype)
    g_ref[0] = proj(wg_ref, bg_ref).astype(g_ref.dtype)


# ---------------------------------------------------------------------------
# Kernel 2: flash-style attention + W projection + residual
#   grid = (B, N//TQ, N//TK); key axis last ("arbitrary"), resident accumulators.
# ---------------------------------------------------------------------------
def _attn_kernel(th_ref, ph_ref, g_ref, x_ref, ww_ref, bw_ref, o_ref,
                 m_sc, l_sc, acc_sc):
    k = pl.program_id(2)

    @pl.when(k == 0)
    def _():
        m_sc[...] = jnp.full_like(m_sc, -jnp.inf)
        l_sc[...] = jnp.zeros_like(l_sc)
        acc_sc[...] = jnp.zeros_like(acc_sc)

    theta = th_ref[0]                                    # (Ci, TQ)
    phi = ph_ref[0]                                      # (Ci, TK)
    gval = g_ref[0]                                      # (Ci, TK)

    # s[q, j] = sum_c theta[c, q] * phi[c, j]   (no explicit transpose)
    s = jax.lax.dot_general(theta, phi, (((0,), (0,)), ((), ())),
                            preferred_element_type=jnp.float32)   # (TQ, TK) f32

    # online softmax update
    m_prev = m_sc[...]
    m_new = jnp.maximum(m_prev, jnp.max(s, axis=-1, keepdims=True))
    alpha = jnp.exp(m_prev - m_new)                       # (TQ, 1)
    p = jnp.exp(s - m_new)                                # (TQ, TK) f32
    l_sc[...] = alpha * l_sc[...] + jnp.sum(p, axis=-1, keepdims=True)

    # acc[q, c] += sum_j p[q, j] * g[c, j]
    acc_sc[...] = alpha * acc_sc[...] + jax.lax.dot_general(
        p.astype(gval.dtype), gval, (((1,), (1,)), ((), ())),
        preferred_element_type=jnp.float32)               # (TQ, Ci)
    m_sc[...] = m_new

    @pl.when(k == pl.num_programs(2) - 1)
    def _():
        # Exact divide: runs once per output tile, so there is no perf benefit to the
        # approximate EUP reciprocal and it only costs accuracy.
        y = acc_sc[...] / l_sc[...]                       # (TQ, Ci) f32
        # out[o, q] = sum_c w_W[o, c] * y[q, c] + b_W[o] + x[o, q]
        wy = jax.lax.dot_general(ww_ref[...], y, (((1,), (1,)), ((), ())),
                                 preferred_element_type=jnp.float32)  # (C, TQ)
        o_ref[0] = (wy + bw_ref[...] + x_ref[0].astype(jnp.float32)
                    ).astype(o_ref.dtype)


# ---------------------------------------------------------------------------
# Wrapper
# ---------------------------------------------------------------------------
@functools.partial(jax.jit, static_argnames=("tq", "tk", "use_bf16"))
def nonlocal_block_pallas(x_nchw, params, *, tq=128, tk=128, use_bf16=True):
    """x_nchw: (B, C, H, W) float32.  params: conv weights in (out, in) matmul form."""
    B, C, H, W = x_nchw.shape
    N = H * W
    Ci = params["w_theta"].shape[0]

    tq = min(tq, N)
    tk = min(tk, N)
    assert N % tq == 0 and N % tk == 0, "spatial size must be divisible by tiles"

    x_bcn = x_nchw.reshape(B, C, N)                       # free reshape, N lane-dense
    proj_dtype = jnp.bfloat16 if use_bf16 else jnp.float32

    def const2d(shape):
        return pl.BlockSpec(shape, lambda *idx: (0, 0))

    # ---- projections ------------------------------------------------------
    theta, phi, g = pl.pallas_call(
        _proj_kernel,
        out_shape=(jax.ShapeDtypeStruct((B, Ci, N), proj_dtype),
                   jax.ShapeDtypeStruct((B, Ci, N), proj_dtype),
                   jax.ShapeDtypeStruct((B, Ci, N), proj_dtype)),
        grid_spec=pltpu.PrefetchScalarGridSpec(
            num_scalar_prefetch=0,
            grid=(B, N // tq),
            in_specs=[
                pl.BlockSpec((1, C, tq), lambda b, i: (b, 0, i)),   # x
                const2d((Ci, C)), const2d((Ci, 1)),                 # theta w/b
                const2d((Ci, C)), const2d((Ci, 1)),                 # phi   w/b
                const2d((Ci, C)), const2d((Ci, 1)),                 # g     w/b
            ],
            out_specs=[pl.BlockSpec((1, Ci, tq), lambda b, i: (b, 0, i))] * 3,
        ),
        compiler_params=pltpu.CompilerParams(
            dimension_semantics=("parallel", "parallel")),
    )(x_bcn,
      params["w_theta"], params["b_theta"],
      params["w_phi"], params["b_phi"],
      params["w_g"], params["b_g"])

    # ---- flash attention + W + residual ------------------------------------
    out = pl.pallas_call(
        _attn_kernel,
        out_shape=jax.ShapeDtypeStruct((B, C, N), x_nchw.dtype),
        grid_spec=pltpu.PrefetchScalarGridSpec(
            num_scalar_prefetch=0,
            grid=(B, N // tq, N // tk),
            in_specs=[
                pl.BlockSpec((1, Ci, tq), lambda b, i, k: (b, 0, i)),  # theta (q tile)
                pl.BlockSpec((1, Ci, tk), lambda b, i, k: (b, 0, k)),  # phi   (k tile)
                pl.BlockSpec((1, Ci, tk), lambda b, i, k: (b, 0, k)),  # g     (k tile)
                pl.BlockSpec((1, C, tq), lambda b, i, k: (b, 0, i)),   # x residual
                pl.BlockSpec((C, Ci), lambda b, i, k: (0, 0)),         # w_W
                pl.BlockSpec((C, 1), lambda b, i, k: (0, 0)),          # b_W
            ],
            out_specs=pl.BlockSpec((1, C, tq), lambda b, i, k: (b, 0, i)),
            scratch_shapes=[
                pltpu.VMEM((tq, 1), jnp.float32),    # m (running max)
                pltpu.VMEM((tq, 1), jnp.float32),    # l (running denom)
                pltpu.VMEM((tq, Ci), jnp.float32),   # acc
            ],
        ),
        compiler_params=pltpu.CompilerParams(
            dimension_semantics=("parallel", "parallel", "arbitrary")),
    )(theta, phi, g, x_bcn, params["w_W"], params["b_W"])

    return out.reshape(B, C, H, W)


# ---------------------------------------------------------------------------
# Parameters (conv weights stored directly in (out_ch, in_ch) matmul form)
# ---------------------------------------------------------------------------
def init_params(key, in_channels):
    inter = in_channels // 2
    ks = jax.random.split(key, 6)
    scale = 1.0 / jnp.sqrt(in_channels)
    return {
        "w_theta": jax.random.uniform(ks[0], (inter, in_channels), jnp.float32, -scale, scale),
        "b_theta": jax.random.uniform(ks[1], (inter, 1), jnp.float32, -scale, scale),
        "w_phi":   jax.random.uniform(ks[2], (inter, in_channels), jnp.float32, -scale, scale),
        "b_phi":   jax.random.uniform(ks[3], (inter, 1), jnp.float32, -scale, scale),
        "w_g":     jax.random.uniform(ks[4], (inter, in_channels), jnp.float32, -scale, scale),
        "b_g":     jax.random.uniform(ks[5], (inter, 1), jnp.float32, -scale, scale),
        # W conv is zero-initialized in the module
        "w_W":     jnp.zeros((in_channels, inter), jnp.float32),
        "b_W":     jnp.zeros((in_channels, 1), jnp.float32),
    }


# ---------------------------------------------------------------------------
# Pure-JAX reference mirroring the PyTorch forward (HIGHEST precision so the
# reference is accurate f32 even on real TPU hardware / interpret-on-TPU).
# ---------------------------------------------------------------------------
def nonlocal_block_ref(x_nchw, params):
    hp = jax.lax.Precision.HIGHEST
    B, C, H, W = x_nchw.shape
    N = H * W
    x = x_nchw.reshape(B, C, N)
    theta = jnp.einsum("oc,bcn->bon", params["w_theta"], x, precision=hp) + params["b_theta"][None]
    phi = jnp.einsum("oc,bcn->bon", params["w_phi"], x, precision=hp) + params["b_phi"][None]
    g = jnp.einsum("oc,bcn->bon", params["w_g"], x, precision=hp) + params["b_g"][None]
    f = jnp.einsum("bcq,bck->bqk", theta, phi, precision=hp)        # (B, N, N)
    p = jax.nn.softmax(f, axis=-1)
    y = jnp.einsum("bqk,bck->bqc", p, g, precision=hp)              # (B, N, Ci)
    wy = jnp.einsum("oc,bqc->boq", params["w_W"], y, precision=hp) + params["b_W"][None]
    return (wy + x).reshape(B, C, H, W)


if __name__ == "__main__":
    key = jax.random.PRNGKey(0)
    kx, kp = jax.random.split(key)

    B, C, H, W = 2, 8, 16, 16                  # in_channels=8 -> inter_channels=4
    x = jax.random.normal(kx, (B, C, H, W), jnp.float32)
    params = init_params(kp, C)                # W conv zero-initialized, as in the module

    # --- zero W (module's init): output must equal the input exactly --------
    out0 = jax.block_until_ready(nonlocal_block_pallas(x, params, use_bf16=False))
    ref0 = nonlocal_block_ref(x, params)
    assert jnp.allclose(out0, ref0, atol=1e-5, rtol=1e-5)
    assert jnp.allclose(out0, x, atol=1e-5)

    # --- non-zero W to exercise the full attention path ----------------------
    params_nz = dict(params)
    kw, kb = jax.random.split(kp)
    sc = 1.0 / jnp.sqrt(C // 2)
    params_nz["w_W"] = jax.random.uniform(kw, (C, C // 2), jnp.float32, -sc, sc)
    params_nz["b_W"] = jax.random.uniform(kb, (C, 1), jnp.float32, -sc, sc)
    ref_nz = nonlocal_block_ref(x, params_nz)

    # f32 operands (tolerance allows for DEFAULT-precision f32 dots on TPU backends)
    out_f32 = jax.block_until_ready(nonlocal_block_pallas(x, params_nz, use_bf16=False))
    assert jnp.allclose(out_f32, ref_nz, atol=2e-2, rtol=2e-2)

    # bf16 operands for the two big matmuls (f32 accumulation): fast path
    out_bf16 = jax.block_until_ready(nonlocal_block_pallas(x, params_nz, use_bf16=True))
    assert jnp.allclose(out_bf16, ref_nz, atol=1e-1, rtol=1e-1)

    # bf16 fast path still preserves the zero-W identity exactly
    out_bf0 = jax.block_until_ready(nonlocal_block_pallas(x, params, use_bf16=True))
    assert jnp.allclose(out_bf0, x, atol=1e-5)

    print("KERNEL_OK")
</pallas_src>

<mosaic_0001>
module attributes {stable_mosaic.version = 11 : i64} {
  func.func @_proj_kernel(%arg0: i32, %arg1: i32, %arg2: memref<1x8x128xf32, #tpu.memory_space<vmem>>, %arg3: memref<4x8xf32, #tpu.memory_space<vmem>>, %arg4: memref<4x1xf32, #tpu.memory_space<vmem>>, %arg5: memref<4x8xf32, #tpu.memory_space<vmem>>, %arg6: memref<4x1xf32, #tpu.memory_space<vmem>>, %arg7: memref<4x8xf32, #tpu.memory_space<vmem>>, %arg8: memref<4x1xf32, #tpu.memory_space<vmem>>, %arg9: memref<1x4x128xf32, #tpu.memory_space<vmem>>, %arg10: memref<1x4x128xf32, #tpu.memory_space<vmem>>, %arg11: memref<1x4x128xf32, #tpu.memory_space<vmem>>) attributes {dimension_semantics = [#tpu.dimension_semantics<parallel>, #tpu.dimension_semantics<parallel>], iteration_bounds = array<i64: 2, 2>, scalar_prefetch = 0 : i64, scratch_operands = 0 : i64, tpu.core_type = #tpu.core_type<tc>, window_params = [{transform_indices = @transform_0, window_bounds = array<i64: 1, 8, 128>}, {pipeline_mode = #tpu.pipeline_mode<synchronous>, transform_indices = @transform_1, window_bounds = array<i64: 4, 8>}, {pipeline_mode = #tpu.pipeline_mode<synchronous>, transform_indices = @transform_2, window_bounds = array<i64: 4, 1>}, {pipeline_mode = #tpu.pipeline_mode<synchronous>, transform_indices = @transform_3, window_bounds = array<i64: 4, 8>}, {pipeline_mode = #tpu.pipeline_mode<synchronous>, transform_indices = @transform_4, window_bounds = array<i64: 4, 1>}, {pipeline_mode = #tpu.pipeline_mode<synchronous>, transform_indices = @transform_5, window_bounds = array<i64: 4, 8>}, {pipeline_mode = #tpu.pipeline_mode<synchronous>, transform_indices = @transform_6, window_bounds = array<i64: 4, 1>}, {transform_indices = @transform_7, window_bounds = array<i64: 1, 4, 128>}, {transform_indices = @transform_8, window_bounds = array<i64: 1, 4, 128>}, {transform_indices = @transform_9, window_bounds = array<i64: 1, 4, 128>}]} {
    %c0 = arith.constant 0 : index
    %c0_0 = arith.constant 0 : index
    %c0_1 = arith.constant 0 : index
    %0 = vector.load %arg2[%c0, %c0_0, %c0_1] : memref<1x8x128xf32, #tpu.memory_space<vmem>>, vector<1x8x128xf32>
    %1 = vector.shape_cast %0 : vector<1x8x128xf32> to vector<8x128xf32>
    %c0_2 = arith.constant 0 : index
    %c0_3 = arith.constant 0 : index
    %2 = vector.load %arg3[%c0_2, %c0_3] : memref<4x8xf32, #tpu.memory_space<vmem>>, vector<4x8xf32>
    %cst = arith.constant dense<0.000000e+00> : vector<4x128xf32>
    %3 = tpu.matmul %2, %1, %cst {dimension_numbers = #tpu.dot_dimension_numbers<[1], [0], [0], [1], [0, 0, 1, 1], [], []>} : vector<4x8xf32>, vector<8x128xf32>, vector<4x128xf32> -> vector<4x128xf32>
    %c0_4 = arith.constant 0 : index
    %c0_5 = arith.constant 0 : index
    %4 = vector.load %arg4[%c0_4, %c0_5] : memref<4x1xf32, #tpu.memory_space<vmem>>, vector<4x1xf32>
    %5 = vector.broadcast %4 : vector<4x1xf32> to vector<4x128xf32>
    %6 = arith.addf %3, %5 : vector<4x128xf32>
    %c0_6 = arith.constant 0 : index
    %c0_7 = arith.constant 0 : index
    %c0_8 = arith.constant 0 : index
    %7 = vector.load %arg9[%c0_6, %c0_7, %c0_8] : memref<1x4x128xf32, #tpu.memory_space<vmem>>, vector<1x4x128xf32>
    %8 = vector.shape_cast %7 : vector<1x4x128xf32> to vector<4x128xf32>
    %9 = vector.shape_cast %6 : vector<4x128xf32> to vector<1x4x128xf32>
    tpu.vector_store %arg9[%c0_6, %c0_7, %c0_8], %9 {strides = array<i32>} : memref<1x4x128xf32, #tpu.memory_space<vmem>>, vector<1x4x128xf32>,
    %c0_9 = arith.constant 0 : index
    %c0_10 = arith.constant 0 : index
    %10 = vector.load %arg5[%c0_9, %c0_10] : memref<4x8xf32, #tpu.memory_space<vmem>>, vector<4x8xf32>
    %cst_11 = arith.constant dense<0.000000e+00> : vector<4x128xf32>
    %11 = tpu.matmul %10, %1, %cst_11 {dimension_numbers = #tpu.dot_dimension_numbers<[1], [0], [0], [1], [0, 0, 1, 1], [], []>} : vector<4x8xf32>, vector<8x128xf32>, vector<4x128xf32> -> vector<4x128xf32>
    %c0_12 = arith.constant 0 : index
    %c0_13 = arith.constant 0 : index
    %12 = vector.load %arg6[%c0_12, %c0_13] : memref<4x1xf32, #tpu.memory_space<vmem>>, vector<4x1xf32>
    %13 = vector.broadcast %12 : vector<4x1xf32> to vector<4x128xf32>
    %14 = arith.addf %11, %13 : vector<4x128xf32>
    %c0_14 = arith.constant 0 : index
    %c0_15 = arith.constant 0 : index
    %c0_16 = arith.constant 0 : index
    %15 = vector.load %arg10[%c0_14, %c0_15, %c0_16] : memref<1x4x128xf32, #tpu.memory_space<vmem>>, vector<1x4x128xf32>
    %16 = vector.shape_cast %15 : vector<1x4x128xf32> to vector<4x128xf32>
    %17 = vector.shape_cast %14 : vector<4x128xf32> to vector<1x4x128xf32>
    tpu.vector_store %arg10[%c0_14, %c0_15, %c0_16], %17 {strides = array<i32>} : memref<1x4x128xf32, #tpu.memory_space<vmem>>, vector<1x4x128xf32>,
    %c0_17 = arith.constant 0 : index
    %c0_18 = arith.constant 0 : index
    %18 = vector.load %arg7[%c0_17, %c0_18] : memref<4x8xf32, #tpu.memory_space<vmem>>, vector<4x8xf32>
    %cst_19 = arith.constant dense<0.000000e+00> : vector<4x128xf32>
    %19 = tpu.matmul %18, %1, %cst_19 {dimension_numbers = #tpu.dot_dimension_numbers<[1], [0], [0], [1], [0, 0, 1, 1], [], []>} : vector<4x8xf32>, vector<8x128xf32>, vector<4x128xf32> -> vector<4x128xf32>
    %c0_20 = arith.constant 0 : index
    %c0_21 = arith.constant 0 : index
    %20 = vector.load %arg8[%c0_20, %c0_21] : memref<4x1xf32, #tpu.memory_space<vmem>>, vector<4x1xf32>
    %21 = vector.broadcast %20 : vector<4x1xf32> to vector<4x128xf32>
    %22 = arith.addf %19, %21 : vector<4x128xf32>
    %c0_22 = arith.constant 0 : index
    %c0_23 = arith.constant 0 : index
    %c0_24 = arith.constant 0 : index
    %23 = vector.load %arg11[%c0_22, %c0_23, %c0_24] : memref<1x4x128xf32, #tpu.memory_space<vmem>>, vector<1x4x128xf32>
    %24 = vector.shape_cast %23 : vector<1x4x128xf32> to vector<4x128xf32>
    %25 = vector.shape_cast %22 : vector<4x128xf32> to vector<1x4x128xf32>
    tpu.vector_store %arg11[%c0_22, %c0_23, %c0_24], %25 {strides = array<i32>} : memref<1x4x128xf32, #tpu.memory_space<vmem>>, vector<1x4x128xf32>,
    return
  }
  func.func @transform_0(%arg0: i32, %arg1: i32) -> (i32, i32, i32) {
    %c0_i32 = arith.constant 0 : i32
    %c0_i32_0 = arith.constant 0 : i32
    return %arg0, %c0_i32, %arg1 : i32, i32, i32
  }
  func.func @transform_1(%arg0: i32, %arg1: i32) -> (i32, i32) {
    %c0_i32 = arith.constant 0 : i32
    %c0_i32_0 = arith.constant 0 : i32
    %c0_i32_1 = arith.constant 0 : i32
    return %c0_i32, %c0_i32_0 : i32, i32
  }
  func.func @transform_2(%arg0: i32, %arg1: i32) -> (i32, i32) {
    %c0_i32 = arith.constant 0 : i32
    %c0_i32_0 = arith.constant 0 : i32
    %c0_i32_1 = arith.constant 0 : i32
    return %c0_i32, %c0_i32_0 : i32, i32
  }
  func.func @transform_3(%arg0: i32, %arg1: i32) -> (i32, i32) {
    %c0_i32 = arith.constant 0 : i32
    %c0_i32_0 = arith.constant 0 : i32
    %c0_i32_1 = arith.constant 0 : i32
    return %c0_i32, %c0_i32_0 : i32, i32
  }
  func.func @transform_4(%arg0: i32, %arg1: i32) -> (i32, i32) {
    %c0_i32 = arith.constant 0 : i32
    %c0_i32_0 = arith.constant 0 : i32
    %c0_i32_1 = arith.constant 0 : i32
    return %c0_i32, %c0_i32_0 : i32, i32
  }
  func.func @transform_5(%arg0: i32, %arg1: i32) -> (i32, i32) {
    %c0_i32 = arith.constant 0 : i32
    %c0_i32_0 = arith.constant 0 : i32
    %c0_i32_1 = arith.constant 0 : i32
    return %c0_i32, %c0_i32_0 : i32, i32
  }
  func.func @transform_6(%arg0: i32, %arg1: i32) -> (i32, i32) {
    %c0_i32 = arith.constant 0 : i32
    %c0_i32_0 = arith.constant 0 : i32
    %c0_i32_1 = arith.constant 0 : i32
    return %c0_i32, %c0_i32_0 : i32, i32
  }
  func.func @transform_7(%arg0: i32, %arg1: i32) -> (i32, i32, i32) {
    %c0_i32 = arith.constant 0 : i32
    %c0_i32_0 = arith.constant 0 : i32
    return %arg0, %c0_i32, %arg1 : i32, i32, i32
  }
  func.func @transform_8(%arg0: i32, %arg1: i32) -> (i32, i32, i32) {
    %c0_i32 = arith.constant 0 : i32
    %c0_i32_0 = arith.constant 0 : i32
    return %arg0, %c0_i32, %arg1 : i32, i32, i32
  }
  func.func @transform_9(%arg0: i32, %arg1: i32) -> (i32, i32, i32) {
    %c0_i32 = arith.constant 0 : i32
    %c0_i32_0 = arith.constant 0 : i32
    return %arg0, %c0_i32, %arg1 : i32, i32, i32
  }
}

module attributes {stable_mosaic.version = 11 : i64} {
  func.func @_attn_kernel(%arg0: i32, %arg1: i32, %arg2: i32, %arg3: memref<1x4x128xf32, #tpu.memory_space<vmem>>, %arg4: memref<1x4x128xf32, #tpu.memory_space<vmem>>, %arg5: memref<1x4x128xf32, #tpu.memory_space<vmem>>, %arg6: memref<1x8x128xf32, #tpu.memory_space<vmem>>, %arg7: memref<8x4xf32, #tpu.memory_space<vmem>>, %arg8: memref<8x1xf32, #tpu.memory_space<vmem>>, %arg9: memref<1x8x128xf32, #tpu.memory_space<vmem>>, %arg10: memref<128x1xf32, #tpu.memory_space<vmem>>, %arg11: memref<128x1xf32, #tpu.memory_space<vmem>>, %arg12: memref<128x4xf32, #tpu.memory_space<vmem>>) attributes {dimension_semantics = [#tpu.dimension_semantics<parallel>, #tpu.dimension_semantics<parallel>, #tpu.dimension_semantics<arbitrary>], iteration_bounds = array<i64: 2, 2, 2>, scalar_prefetch = 0 : i64, scratch_operands = 3 : i64, tpu.core_type = #tpu.core_type<tc>, window_params = [{transform_indices = @transform_0, window_bounds = array<i64: 1, 4, 128>}, {transform_indices = @transform_1, window_bounds = array<i64: 1, 4, 128>}, {transform_indices = @transform_2, window_bounds = array<i64: 1, 4, 128>}, {transform_indices = @transform_3, window_bounds = array<i64: 1, 8, 128>}, {pipeline_mode = #tpu.pipeline_mode<synchronous>, transform_indices = @transform_4, window_bounds = array<i64: 8, 4>}, {pipeline_mode = #tpu.pipeline_mode<synchronous>, transform_indices = @transform_5, window_bounds = array<i64: 8, 1>}, {transform_indices = @transform_6, window_bounds = array<i64: 1, 8, 128>}]} {
    %c0_i32 = arith.constant 0 : i32
    %0 = arith.cmpi eq, %arg2, %c0_i32 : i32
    %1 = arith.extui %0 : i1 to i32
    %c0_i32_0 = arith.constant 0 : i32
    %2 = arith.cmpi ne, %1, %c0_i32_0 : i32
    scf.if %2 {
      %cst_25 = arith.constant 0xFF800000 : f32
      %35 = vector.broadcast %cst_25 : f32 to vector<128x1xf32>
      %c0_26 = arith.constant 0 : index
      %c0_27 = arith.constant 0 : index
      %36 = vector.load %arg10[%c0_26, %c0_27] : memref<128x1xf32, #tpu.memory_space<vmem>>, vector<128x1xf32>
      tpu.vector_store %arg10[%c0_26, %c0_27], %35 {strides = array<i32>} : memref<128x1xf32, #tpu.memory_space<vmem>>, vector<128x1xf32>,
      %cst_28 = arith.constant 0.000000e+00 : f32
      %37 = vector.broadcast %cst_28 : f32 to vector<128x1xf32>
      %c0_29 = arith.constant 0 : index
      %c0_30 = arith.constant 0 : index
      %38 = vector.load %arg11[%c0_29, %c0_30] : memref<128x1xf32, #tpu.memory_space<vmem>>, vector<128x1xf32>
      tpu.vector_store %arg11[%c0_29, %c0_30], %37 {strides = array<i32>} : memref<128x1xf32, #tpu.memory_space<vmem>>, vector<128x1xf32>,
      %cst_31 = arith.constant 0.000000e+00 : f32
      %39 = vector.broadcast %cst_31 : f32 to vector<128x4xf32>
      %c0_32 = arith.constant 0 : index
      %c0_33 = arith.constant 0 : index
      %40 = vector.load %arg12[%c0_32, %c0_33] : memref<128x4xf32, #tpu.memory_space<vmem>>, vector<128x4xf32>
      tpu.vector_store %arg12[%c0_32, %c0_33], %39 {strides = array<i32>} : memref<128x4xf32, #tpu.memory_space<vmem>>, vector<128x4xf32>,
    } else {
    }
    %c0 = arith.constant 0 : index
    %c0_1 = arith.constant 0 : index
    %c0_2 = arith.constant 0 : index
    %3 = vector.load %arg3[%c0, %c0_1, %c0_2] : memref<1x4x128xf32, #tpu.memory_space<vmem>>, vector<1x4x128xf32>
    %4 = vector.shape_cast %3 : vector<1x4x128xf32> to vector<4x128xf32>
    %c0_3 = arith.constant 0 : index
    %c0_4 = arith.constant 0 : index
    %c0_5 = arith.constant 0 : index
    %5 = vector.load %arg4[%c0_3, %c0_4, %c0_5] : memref<1x4x128xf32, #tpu.memory_space<vmem>>, vector<1x4x128xf32>
    %6 = vector.shape_cast %5 : vector<1x4x128xf32> to vector<4x128xf32>
    %c0_6 = arith.constant 0 : index
    %c0_7 = arith.constant 0 : index
    %c0_8 = arith.constant 0 : index
    %7 = vector.load %arg5[%c0_6, %c0_7, %c0_8] : memref<1x4x128xf32, #tpu.memory_space<vmem>>, vector<1x4x128xf32>
    %8 = vector.shape_cast %7 : vector<1x4x128xf32> to vector<4x128xf32>
    %cst = arith.constant dense<0.000000e+00> : vector<128x128xf32>
    %9 = tpu.matmul %4, %6, %cst {dimension_numbers = #tpu.dot_dimension_numbers<[0], [0], [1], [1], [0, 1, 1, 1], [], []>} : vector<4x128xf32>, vector<4x128xf32>, vector<128x128xf32> -> vector<128x128xf32>
    %c0_9 = arith.constant 0 : index
    %c0_10 = arith.constant 0 : index
    %10 = vector.load %arg10[%c0_9, %c0_10] : memref<128x1xf32, #tpu.memory_space<vmem>>, vector<128x1xf32>
    %cst_11 = arith.constant dense<0xFF800000> : vector<128xf32>
    %11 = vector.multi_reduction <maximumf>, %9, %cst_11 [1] : vector<128x128xf32> to vector<128xf32>
    %12 = vector.shape_cast %11 : vector<128xf32> to vector<128x1xf32>
    %13 = arith.maximumf %10, %12 : vector<128x1xf32>
    %14 = arith.subf %10, %13 : vector<128x1xf32>
    %15 = math.exp %14 : vector<128x1xf32>
    %16 = vector.broadcast %13 : vector<128x1xf32> to vector<128x128xf32>
    %17 = arith.subf %9, %16 : vector<128x128xf32>
    %18 = math.exp %17 : vector<128x128xf32>
    %c0_12 = arith.constant 0 : index
    %c0_13 = arith.constant 0 : index
    %19 = vector.load %arg11[%c0_12, %c0_13] : memref<128x1xf32, #tpu.memory_space<vmem>>, vector<128x1xf32>
    %20 = arith.mulf %15, %19 : vector<128x1xf32>
    %cst_14 = arith.constant dense<0.000000e+00> : vector<128xf32>
    %21 = vector.multi_reduction <add>, %18, %cst_14 [1] : vector<128x128xf32> to vector<128xf32>
    %22 = vector.shape_cast %21 : vector<128xf32> to vector<128x1xf32>
    %23 = arith.addf %20, %22 : vector<128x1xf32>
    %c0_15 = arith.constant 0 : index
    %c0_16 = arith.constant 0 : index
    %24 = vector.load %arg11[%c0_15, %c0_16] : memref<128x1xf32, #tpu.memory_space<vmem>>, vector<128x1xf32>
    tpu.vector_store %arg11[%c0_15, %c0_16], %23 {strides = array<i32>} : memref<128x1xf32, #tpu.memory_space<vmem>>, vector<128x1xf32>,
    %c0_17 = arith.constant 0 : index
    %c0_18 = arith.constant 0 : index
    %25 = vector.load %arg12[%c0_17, %c0_18] : memref<128x4xf32, #tpu.memory_space<vmem>>, vector<128x4xf32>
    %26 = vector.broadcast %15 : vector<128x1xf32> to vector<128x4xf32>
    %27 = arith.mulf %26, %25 : vector<128x4xf32>
    %cst_19 = arith.constant dense<0.000000e+00> : vector<128x4xf32>
    %28 = tpu.matmul %18, %8, %cst_19 {dimension_numbers = #tpu.dot_dimension_numbers<[1], [1], [0], [0], [0, 0, 1, 0], [], []>} : vector<128x128xf32>, vector<4x128xf32>, vector<128x4xf32> -> vector<128x4xf32>
    %29 = arith.addf %27, %28 : vector<128x4xf32>
    %c0_20 = arith.constant 0 : index
    %c0_21 = arith.constant 0 : index
    %30 = vector.load %arg12[%c0_20, %c0_21] : memref<128x4xf32, #tpu.memory_space<vmem>>, vector<128x4xf32>
    tpu.vector_store %arg12[%c0_20, %c0_21], %29 {strides = array<i32>} : memref<128x4xf32, #tpu.memory_space<vmem>>, vector<128x4xf32>,
    %c0_22 = arith.constant 0 : index
    %c0_23 = arith.constant 0 : index
    %31 = vector.load %arg10[%c0_22, %c0_23] : memref<128x1xf32, #tpu.memory_space<vmem>>, vector<128x1xf32>
    tpu.vector_store %arg10[%c0_22, %c0_23], %13 {strides = array<i32>} : memref<128x1xf32, #tpu.memory_space<vmem>>, vector<128x1xf32>,
    %c1_i32 = arith.constant 1 : i32
    %32 = arith.cmpi eq, %arg2, %c1_i32 : i32
    %33 = arith.extui %32 : i1 to i32
    %c0_i32_24 = arith.constant 0 : i32
    %34 = arith.cmpi ne, %33, %c0_i32_24 : i32
    scf.if %34 {
      %c0_25 = arith.constant 0 : index
      %c0_26 = arith.constant 0 : index
      %35 = vector.load %arg12[%c0_25, %c0_26] : memref<128x4xf32, #tpu.memory_space<vmem>>, vector<128x4xf32>
      %c0_27 = arith.constant 0 : index
      %c0_28 = arith.constant 0 : index
      %36 = vector.load %arg11[%c0_27, %c0_28] : memref<128x1xf32, #tpu.memory_space<vmem>>, vector<128x1xf32>
      %37 = vector.broadcast %36 : vector<128x1xf32> to vector<128x4xf32>
      %38 = arith.divf %35, %37 : vector<128x4xf32>
      %c0_29 = arith.constant 0 : index
      %c0_30 = arith.constant 0 : index
      %39 = vector.load %arg7[%c0_29, %c0_30] : memref<8x4xf32, #tpu.memory_space<vmem>>, vector<8x4xf32>
      %cst_31 = arith.constant dense<0.000000e+00> : vector<8x128xf32>
      %40 = tpu.matmul %39, %38, %cst_31 {dimension_numbers = #tpu.dot_dimension_numbers<[1], [1], [0], [0], [0, 0, 1, 0], [], []>} : vector<8x4xf32>, vector<128x4xf32>, vector<8x128xf32> -> vector<8x128xf32>
      %c0_32 = arith.constant 0 : index
      %c0_33 = arith.constant 0 : index
      %41 = vector.load %arg8[%c0_32, %c0_33] : memref<8x1xf32, #tpu.memory_space<vmem>>, vector<8x1xf32>
      %42 = vector.broadcast %41 : vector<8x1xf32> to vector<8x128xf32>
      %43 = arith.addf %40, %42 : vector<8x128xf32>
      %c0_34 = arith.constant 0 : index
      %c0_35 = arith.constant 0 : index
      %c0_36 = arith.constant 0 : index
      %44 = vector.load %arg6[%c0_34, %c0_35, %c0_36] : memref<1x8x128xf32, #tpu.memory_space<vmem>>, vector<1x8x128xf32>
      %45 = vector.shape_cast %44 : vector<1x8x128xf32> to vector<8x128xf32>
      %46 = arith.addf %43, %45 : vector<8x128xf32>
      %c0_37 = arith.constant 0 : index
      %c0_38 = arith.constant 0 : index
      %c0_39 = arith.constant 0 : index
      %47 = vector.load %arg9[%c0_37, %c0_38, %c0_39] : memref<1x8x128xf32, #tpu.memory_space<vmem>>, vector<1x8x128xf32>
      %48 = vector.shape_cast %47 : vector<1x8x128xf32> to vector<8x128xf32>
      %49 = vector.shape_cast %46 : vector<8x128xf32> to vector<1x8x128xf32>
      tpu.vector_store %arg9[%c0_37, %c0_38, %c0_39], %49 {strides = array<i32>} : memref<1x8x128xf32, #tpu.memory_space<vmem>>, vector<1x8x128xf32>,
    } else {
    }
    return
  }
  func.func @transform_0(%arg0: i32, %arg1: i32, %arg2: i32) -> (i32, i32, i32) {
    %c0_i32 = arith.constant 0 : i32
    %c0_i32_0 = arith.constant 0 : i32
    return %arg0, %c0_i32, %arg1 : i32, i32, i32
  }
  func.func @transform_1(%arg0: i32, %arg1: i32, %arg2: i32) -> (i32, i32, i32) {
    %c0_i32 = arith.constant 0 : i32
    %c0_i32_0 = arith.constant 0 : i32
    return %arg0, %c0_i32, %arg2 : i32, i32, i32
  }
  func.func @transform_2(%arg0: i32, %arg1: i32, %arg2: i32) -> (i32, i32, i32) {
    %c0_i32 = arith.constant 0 : i32
    %c0_i32_0 = arith.constant 0 : i32
    return %arg0, %c0_i32, %arg2 : i32, i32, i32
  }
  func.func @transform_3(%arg0: i32, %arg1: i32, %arg2: i32) -> (i32, i32, i32) {
    %c0_i32 = arith.constant 0 : i32
    %c0_i32_0 = arith.constant 0 : i32
    return %arg0, %c0_i32, %arg1 : i32, i32, i32
  }
  func.func @transform_4(%arg0: i32, %arg1: i32, %arg2: i32) -> (i32, i32) {
    %c0_i32 = arith.constant 0 : i32
    %c0_i32_0 = arith.constant 0 : i32
    %c0_i32_1 = arith.constant 0 : i32
    return %c0_i32, %c0_i32_0 : i32, i32
  }
  func.func @transform_5(%arg0: i32, %arg1: i32, %arg2: i32) -> (i32, i32) {
    %c0_i32 = arith.constant 0 : i32
    %c0_i32_0 = arith.constant 0 : i32
    %c0_i32_1 = arith.constant 0 : i32
    return %c0_i32, %c0_i32_0 : i32, i32
  }
  func.func @transform_6(%arg0: i32, %arg1: i32, %arg2: i32) -> (i32, i32, i32) {
    %c0_i32 = arith.constant 0 : i32
    %c0_i32_0 = arith.constant 0 : i32
    return %arg0, %c0_i32, %arg1 : i32, i32, i32
  }
}

</mosaic_0001>

<bundles_post_ra>
// kernel: nonlocal_block_pallas.2
= control target key start
LH: loop header
LB: loop body
LE: loop exit
PB: predicated region body
PF: predicated region fallthrough
CT: control target
= control target key end

     0   :  { %s1007_s30 = smov 0   ;;  %s1009_s10 = smov 0   ;;  %s1085_s0 = inlined_call_operand.vmem [shape: f32[2,8,256], index: 0, kind: input, shape index: {}]   ;;  %s1086_s1 = inlined_call_operand.vmem [shape: f32[4,8], index: 1, kind: input, shape index: {}]   ;;  %s1087_s2 = inlined_call_operand.vmem [shape: f32[4,1], index: 2, kind: input, shape index: {}]   ;;  %s1088_s3 = inlined_call_operand.vmem [shape: f32[4,8], index: 3, kind: input, shape index: {}]   ;;  %s1089_s4 = inlined_call_operand.vmem [shape: f32[4,1], index: 4, kind: input, shape index: {}]   ;;  %s1090_s5 = inlined_call_operand.vmem [shape: f32[4,8], index: 5, kind: input, shape index: {}]   ;;  %s1091_s6 = inlined_call_operand.vmem [shape: f32[4,1], index: 6, kind: input, shape index: {}]   ;;  %s1092_s7 = inlined_call_operand.vmem [shape: f32[2,4,256], index: 7, kind: output, shape index: {0}]   ;;  %s1093_s8 = inlined_call_operand.vmem [shape: f32[2,4,256], index: 8, kind: output, shape index: {1}]   ;;  %s1094_s9 = inlined_call_operand.vmem [shape: f32[2,4,256], index: 9, kind: output, shape index: {2}]  }
   0x1   :  { %s1011_s11 = smov 0   ;;  %s1013_s12 = smov 0  }
   0x2   :  { %s1015_s13 = smov 0  }
   0x3 LB: > { %s29_s14 = sadd.s32 1, %s944_s11  ;;  %s32_s15 = sadd.s32 1, %s948_s12  ;;  %s952_s13 = sphi %s1015_s13, %s20_s13   ;;  %s948_s12 = sphi %s1013_s12, %s1098_s12   ;;  %s944_s11 = sphi %s1011_s11, %s1097_s11   ;;  %s940_s10 = sphi %s1009_s10, %s1096_s10   ;;  %s936_s30 = sphi %s1007_s30, %s1095_s30  }
   0x4   : > { %p30_p0 = scmp.ge.s32.totalorder %s29_s14, 2  ;;  %p834_p1 = scmp.ge.s32.totalorder %s952_s13, 1 }
   0x5   : > { %p315_p2 = scmp.lt.s32.totalorder %s952_s13, 5 }
   0x6   : > { %s1100_s14 = smov (%p30_p0, %s29_s14), 0  ;;  %s1102_s15 = smov (!%p30_p0, %s32_s15), %s948_s12 }
   0x7   : > { %p316_p3 = pnand %p834_p1, %p315_p2  ;;  %p34_p4 = scmp.ge.s32.totalorder %s1102_s15, 2 }
   0x8   : > { %p373_p5 = scmp.lt.s32.totalorder (!%p316_p3), %s940_s10, 1  ;;  %p375_p6 = scmp.lt.s32.totalorder (!%p316_p3), %s936_s30, 1  ;;  %v954_v0 = vmov (!%p316_p3), 0.0   ;;  %vm955_vm0 = vmmov (!%p316_p3), 0   ;;  %v407_v1 = vld [vmem:[%s1087_s2] sm:$0xf] (!%p316_p3) }
   0x9   : > { %s1104_s15 = smov (%p34_p4, %s1102_s15), 0  ;;  %319 = sbr.rel (%p316_p3) target bundleno = 242 (0xf2), region = 48 }
   0xa   : > { %854 = vmatprep.subr.mxu0 (!%p316_p3), %v954_v0  ;;  %856 = vmatprep.mubr.msk.f32.mxu0 (!%p316_p3), %vm955_vm0, %v954_v0  ;;  %v956_v2 = vmov (!%p316_p3), 0   ;;  %v570_v3 = vld [vmem:[%s1091_s6] sm:$0xf] (!%p316_p3)  ;;  %vm413_vm1 = vcmask (!%p316_p3), 64512  }
   0xb   : > { %859 = vmatprep.subr.mxu1 (!%p316_p3), %v954_v0  ;;  %861 = vmatprep.mubr.msk.f32.mxu1 (!%p316_p3), %vm955_vm0, %v954_v0  ;;  %v489_v4 = vld [vmem:[%s1089_s4] sm:$0xf] (!%p316_p3) }
   0xc   : > { %912 = vset.pattern.permute.xlu0 (!%p316_p3), %v956_v2  ;;  %913 = vset.pattern.permute.xlu1 (!%p316_p3), %v956_v2  ;;  %v406_v5 = vld [vmem:[%s1086_s1] sm:$0xf] (!%p316_p3) }
   0xd   : > { %410 = vperm.xlu0 (!%p316_p3), %912, %v407_v1   ;;  %573 = vperm.xlu1 (!%p316_p3), %913, %v570_v3   ;;  %v488_v7 = vld [vmem:[%s1088_s3] sm:$0xf] (!%p316_p3) }
   0xe   : > { %v569_v8 = vld [vmem:[%s1090_s5] sm:$0xf] (!%p316_p3) }
  0x10   : > { %s1106_s10 = smov (!%p373_p5, %s940_s10), 1  ;;  %s1108_s30 = smov (!%p375_p6, %s936_s30), 1 }
  0x11   : > { %s835_s20 = sshll.u32 %s1106_s10, 1  ;;  %492 = vperm.xlu0 %912, %v489_v4  }
  0x12   : > { %s378_s21 = sadd.s32 %s835_s20, %s1108_s30 }
  0x13   : > { %s836_s24 = sshll.u32 %s378_s21, 3  ;;  %s838_s18 = sshll.u32 %s378_s21, 2 }
  0x14   : > { %s380_s27 = scalar_lea.vmem %s1085_s0, %s836_s24  ;;  %s388_s22 = scalar_lea.vmem %s1092_s7, %s838_s18 }
  0x15   : > { %v405_v6 = vld [vmem:[%s380_s27] sm:$0xff]  ;;  %s396_s25 = scalar_lea.vmem %s1093_s8, %s838_s18  ;;  %s404_s27 = scalar_lea.vmem %s1094_s9, %s838_s18 }
  0x16   : > { %855 = vmatpush3.msra.mxu0 %v405_v6  ;;  %860 = vmatpush3.msra.mxu1 %v405_v6 }
  0x17   : > { %857 = vmatmul.mubr.msk.f32.vlgmr.msra.gmra.mrb[0].mxu0 %vm413_vm1, %v406_v5  ;;  %864 = vmatprep.subr.mxu0 %v954_v0 }
  0x18   : > { %862 = vmatmul.mubr.msk.f32.vlgmr.msra.gmra.mrb[0].mxu1 %vm413_vm1, %v488_v7  ;;  %865 = vmatpush3.msra.mxu0 %v405_v6 }
  0x19   : > { %866 = vmatprep.mubr.msk.f32.mxu0 %vm955_vm0, %v954_v0 }
  0x1b   : > { %867 = vmatmul.mubr.msk.f32.vlgmr.msra.gmra.mrb[2].mxu0 %vm413_vm1, %v569_v8 }
  0x8c   : > { %v411_v9 = vpop.permute.xlu0 %410  ;;  %v574_v16 = vpop.permute.xlu1 %573 }
  0x90   : > { %v493_v10 = vpop.permute.xlu0 %492 }
  0xea   : > { %v483_v11 = vpop.f32.mrb[0].mxu0 }
  0xeb   : > { %v484_v12 = vadd.f32 %v483_v11, %v411_v9  ;;  %v858_v13 = vpop.f32.mrb[1].mxu0  ;;  %v564_v14 = vpop.f32.mrb[0].mxu1 }
  0xec   : > { %v565_v15 = vadd.f32 %v564_v14, %v493_v10  ;;  %v863_v17 = vpop.f32.mrb[1].mxu1 }
  0xed   : > { %487 = vst [vmem:[%s388_s22] sm:$0xf] %v484_v12 }
  0xee   : > { %568 = vst [vmem:[%s396_s25] sm:$0xf] %v565_v15  ;;  %v645_v18 = vpop.f32.mrb[2].mxu0 }
  0xef   : > { %v646_v19 = vadd.f32 %v645_v18, %v574_v16  ;;  %v868_v20 = vpop.f32.mrb[3].mxu0 }
  0xf1   : > { %649 = vst [vmem:[%s404_s27] sm:$0xf] %v646_v19 }
  0xf2 PF: > { %s20_s13 = sadd.s32 1, %s952_s13   ;;  %s1095_s30 = smov %s944_s11 }
  0xf3   : > { %p17_p7 = scmp.ge.s32.totalorder %s20_s13, 6   ;;  %s1096_s10 = smov %s948_s12 }
  0xf4   : > { %s1097_s11 = smov %s1100_s14  ;;  %s1098_s12 = smov %s1104_s15 }
  0xf5   :  { %19 = sbr.rel (!%p17_p7) target bundleno = 3 (0x3), region = 102 }

// kernel: nonlocal_block_pallas.3
= control target key start
LH: loop header
LB: loop body
LE: loop exit
PB: predicated region body
PF: predicated region fallthrough
CT: control target
= control target key end

     0   :  { %s2222_s21 = smov 0   ;;  %s2224_s22 = smov 0   ;;  %s2713_s0 = inlined_call_operand.vmem [shape: f32[2,4,256], index: 0, kind: input, shape index: {}]   ;;  %s2714_s1 = inlined_call_operand.vmem [shape: f32[2,4,256], index: 1, kind: input, shape index: {}]   ;;  %s2715_s2 = inlined_call_operand.vmem [shape: f32[2,4,256], index: 2, kind: input, shape index: {}]   ;;  %s2716_s3 = inlined_call_operand.vmem [shape: f32[2,8,256], index: 3, kind: input, shape index: {}]   ;;  %s2717_s4 = inlined_call_operand.vmem [shape: f32[8,4], index: 4, kind: input, shape index: {}]   ;;  %s2718_s5 = inlined_call_operand.vmem [shape: f32[8,1], index: 5, kind: input, shape index: {}]   ;;  %s2719_s6 = inlined_call_operand.vmem [shape: f32[2,8,256], index: 6, kind: output, shape index: {}]  }
   0x1   :  { %s2226_s23 = smov 0   ;;  %s2228_s24 = smov 0  }
   0x2   :  { %s2230_s25 = smov 0   ;;  %s2232_s26 = smov 0  }
   0x3   :  { %s2234_s27 = smov 0  }
   0x4 LB: > { %s28_s28 = sadd.s32 1, %s2166_s24  ;;  %s31_s29 = sadd.s32 1, %s2170_s25  ;;  %s2178_s27 = sphi %s2234_s27, %s16_s27   ;;  %s2174_s26 = sphi %s2232_s26, %s2731_s26   ;;  %s2170_s25 = sphi %s2230_s25, %s2730_s25   ;;  %s2166_s24 = sphi %s2228_s24, %s2729_s24   ;;  %s2162_s23 = sphi %s2226_s23, %s2728_s23   ;;  %s2158_s22 = sphi %s2224_s22, %s2727_s22   ;;  %s2154_s21 = sphi %s2222_s21, %s2726_s21  }
   0x5   : > { %p29_p0 = scmp.ge.s32.totalorder %s28_s28, 2  ;;  %p1741_p1 = scmp.ge.s32.totalorder %s2178_s27, 1 }
   0x6   : > { %p283_p2 = scmp.lt.s32.totalorder %s2178_s27, 9  ;;  %s35_s30 = sadd.s32 1, %s2174_s26 }
   0x7   : > { %s2733_s28 = smov (%p29_p0, %s28_s28), 0  ;;  %s2735_s29 = smov (!%p29_p0, %s31_s29), %s2170_s25 }
   0x8   : > { %p284_p3 = pnand %p1741_p1, %p283_p2  ;;  %p33_p4 = scmp.ge.s32.totalorder %s2735_s29, 2 }
   0x9   : > { %p343_p6 = scmp.lt.s32.totalorder (!%p284_p3), %s2162_s23, 1  ;;  %p345_p7 = scmp.lt.s32.totalorder (!%p284_p3), %s2158_s22, 1 }
   0xa   : > { %s2737_s29 = smov (%p33_p4, %s2735_s29), 0  ;;  %s2739_s30 = smov (!%p33_p4, %s35_s30), %s2174_s26 }
   0xb   : > { %2720 = sst [smem:[#allocation5_spill]] %s2737_s29  ;;  %p37_p5 = scmp.ge.s32.totalorder %s2739_s30, 2 }
   0xc   : > { %287 = sbr.rel (%p284_p3) target bundleno = 1325 (0x52d), region = 44  ;;  %p353_p8 = scmp.lt.s32.totalorder (!%p284_p3), %s2154_s21, 1 }
   0xd   : > { %s2741_s30 = smov (%p37_p5, %s2739_s30), 0  ;;  %p1752_p9 = scmp.ne.s32.totalorder (!%p284_p3), %s2154_s21, 0 }
   0xe   : > { %2721 = sst [smem:[#allocation6_spill]] %s2741_s30 }
  0x13   : > { %s2743_s23 = smov (!%p343_p6, %s2162_s23), 1  ;;  %s2745_s22 = smov (!%p345_p7, %s2158_s22), 1 }
  0x14   : > { %s1742_s7 = sshll.u32 %s2743_s23, 1  ;;  %vm387_vm0 = vcmask (!%p1752_p9), 7168   ;;  %vm420_vm1 = vcmask (!%p1752_p9), 31744   ;;  %v2180_v0 = vmov (!%p1752_p9), -inf   ;;  %v2181_v1 = vmov (!%p1752_p9), 0.0  }
  0x15   : > { %s348_s8 = sadd.s32 %s1742_s7, %s2745_s22  ;;  %388 = vst.msk [vmem:[#allocation2] sm:$0xff] (!%p1752_p9), %vm387_vm0, %v2180_v0  ;;  %389 = vst.msk [vmem:[#allocation2 + $0x8] sm:$0xff] (!%p1752_p9), %vm387_vm0, %v2180_v0 }
  0x16   : > { %s1743_s9 = sshll.u32 %s348_s8, 2  ;;  %s1749_s10 = sshll.u32 %s348_s8, 3  ;;  %390 = vst.msk [vmem:[#allocation2 + $0x10] sm:$0xff] (!%p1752_p9), %vm387_vm0, %v2180_v0  ;;  %391 = vst.msk [vmem:[#allocation2 + $0x18] sm:$0xff] (!%p1752_p9), %vm387_vm0, %v2180_v0 }
  0x17   : > { %s2270_s13 = scalar_lea.vmem %s2713_s0, %s1743_s9  ;;  %s2275_s16 = scalar_lea.vmem %s2716_s3, %s1749_s10  ;;  %392 = vst.msk [vmem:[#allocation2 + $0x20] sm:$0xff] (!%p1752_p9), %vm387_vm0, %v2180_v0  ;;  %393 = vst.msk [vmem:[#allocation2 + $0x28] sm:$0xff] (!%p1752_p9), %vm387_vm0, %v2180_v0 }
  0x18   : > { %s354_s17 = scalar_select %p353_p8, %s2154_s21, 1 }
  0x19   : > { %s2281_s20 = scalar_lea.vmem %s2719_s6, %s1749_s10  ;;  %386 = sbr.rel (%p1752_p9) target bundleno = 46 (0x2e), region = 48  ;;  %394 = vst.msk [vmem:[#allocation2 + $0x30] sm:$0xff] (!%p1752_p9), %vm387_vm0, %v2180_v0  ;;  %395 = vst.msk [vmem:[#allocation2 + $0x38] sm:$0xff] (!%p1752_p9), %vm387_vm0, %v2180_v0 }
  0x1a   : > { %s356_s23 = sadd.s32 %s1742_s7, %s354_s17  ;;  %396 = vst.msk [vmem:[#allocation2 + $0x40] sm:$0xff] (!%p1752_p9), %vm387_vm0, %v2180_v0  ;;  %397 = vst.msk [vmem:[#allocation2 + $0x48] sm:$0xff] (!%p1752_p9), %vm387_vm0, %v2180_v0 }
  0x1b   : > { %s1745_s22 = sshll.u32 %s356_s23, 2  ;;  %398 = vst.msk [vmem:[#allocation2 + $0x50] sm:$0xff] (!%p1752_p9), %vm387_vm0, %v2180_v0  ;;  %399 = vst.msk [vmem:[#allocation2 + $0x58] sm:$0xff] (!%p1752_p9), %vm387_vm0, %v2180_v0 }
  0x1c   : > { %s2286_s29 = scalar_lea.vmem %s2714_s1, %s1745_s22  ;;  %s2291_s12 = scalar_lea.vmem %s2715_s2, %s1745_s22  ;;  %400 = vst.msk [vmem:[#allocation2 + $0x60] sm:$0xff] (!%p1752_p9), %vm387_vm0, %v2180_v0  ;;  %401 = vst.msk [vmem:[#allocation2 + $0x68] sm:$0xff] (!%p1752_p9), %vm387_vm0, %v2180_v0 }
  0x1d   : > { %402 = vst.msk [vmem:[#allocation2 + $0x70] sm:$0xff] (!%p1752_p9), %vm387_vm0, %v2180_v0  ;;  %403 = vst.msk [vmem:[#allocation2 + $0x78] sm:$0xff] (!%p1752_p9), %vm387_vm0, %v2180_v0 }
  0x1e   : > { %404 = vst.msk [vmem:[#allocation3] sm:$0xff] (!%p1752_p9), %vm387_vm0, %v2181_v1  ;;  %405 = vst.msk [vmem:[#allocation3 + $0x8] sm:$0xff] (!%p1752_p9), %vm387_vm0, %v2181_v1 }
  0x1f   : > { %406 = vst.msk [vmem:[#allocation3 + $0x10] sm:$0xff] (!%p1752_p9), %vm387_vm0, %v2181_v1  ;;  %407 = vst.msk [vmem:[#allocation3 + $0x18] sm:$0xff] (!%p1752_p9), %vm387_vm0, %v2181_v1 }
  0x20   : > { %408 = vst.msk [vmem:[#allocation3 + $0x20] sm:$0xff] %vm387_vm0, %v2181_v1  ;;  %409 = vst.msk [vmem:[#allocation3 + $0x28] sm:$0xff] %vm387_vm0, %v2181_v1 }
  0x21   : > { %410 = vst.msk [vmem:[#allocation3 + $0x30] sm:$0xff] %vm387_vm0, %v2181_v1  ;;  %411 = vst.msk [vmem:[#allocation3 + $0x38] sm:$0xff] %vm387_vm0, %v2181_v1 }
  0x22   : > { %412 = vst.msk [vmem:[#allocation3 + $0x40] sm:$0xff] %vm387_vm0, %v2181_v1  ;;  %413 = vst.msk [vmem:[#allocation3 + $0x48] sm:$0xff] %vm387_vm0, %v2181_v1 }
  0x23   : > { %414 = vst.msk [vmem:[#allocation3 + $0x50] sm:$0xff] %vm387_vm0, %v2181_v1  ;;  %415 = vst.msk [vmem:[#allocation3 + $0x58] sm:$0xff] %vm387_vm0, %v2181_v1 }
  0x24   : > { %416 = vst.msk [vmem:[#allocation3 + $0x60] sm:$0xff] %vm387_vm0, %v2181_v1  ;;  %417 = vst.msk [vmem:[#allocation3 + $0x68] sm:$0xff] %vm387_vm0, %v2181_v1 }
  0x25   : > { %418 = vst.msk [vmem:[#allocation3 + $0x70] sm:$0xff] %vm387_vm0, %v2181_v1  ;;  %419 = vst.msk [vmem:[#allocation3 + $0x78] sm:$0xff] %vm387_vm0, %v2181_v1 }
  0x26   : > { %421 = vst.msk [vmem:[#allocation4] sm:$0xff] %vm420_vm1, %v2181_v1  ;;  %422 = vst.msk [vmem:[#allocation4 + $0x8] sm:$0xff] %vm420_vm1, %v2181_v1 }
  0x27   : > { %423 = vst.msk [vmem:[#allocation4 + $0x10] sm:$0xff] %vm420_vm1, %v2181_v1  ;;  %424 = vst.msk [vmem:[#allocation4 + $0x18] sm:$0xff] %vm420_vm1, %v2181_v1 }
  0x28   : > { %425 = vst.msk [vmem:[#allocation4 + $0x20] sm:$0xff] %vm420_vm1, %v2181_v1  ;;  %426 = vst.msk [vmem:[#allocation4 + $0x28] sm:$0xff] %vm420_vm1, %v2181_v1 }
  0x29   : > { %427 = vst.msk [vmem:[#allocation4 + $0x30] sm:$0xff] %vm420_vm1, %v2181_v1  ;;  %428 = vst.msk [vmem:[#allocation4 + $0x38] sm:$0xff] %vm420_vm1, %v2181_v1 }
  0x2a   : > { %429 = vst.msk [vmem:[#allocation4 + $0x40] sm:$0xff] %vm420_vm1, %v2181_v1  ;;  %430 = vst.msk [vmem:[#allocation4 + $0x48] sm:$0xff] %vm420_vm1, %v2181_v1 }
  0x2b   : > { %431 = vst.msk [vmem:[#allocation4 + $0x50] sm:$0xff] %vm420_vm1, %v2181_v1  ;;  %432 = vst.msk [vmem:[#allocation4 + $0x58] sm:$0xff] %vm420_vm1, %v2181_v1 }
  0x2c   : > { %433 = vst.msk [vmem:[#allocation4 + $0x60] sm:$0xff] %vm420_vm1, %v2181_v1  ;;  %434 = vst.msk [vmem:[#allocation4 + $0x68] sm:$0xff] %vm420_vm1, %v2181_v1 }
  0x2d   : > { %435 = vst.msk [vmem:[#allocation4 + $0x70] sm:$0xff] %vm420_vm1, %v2181_v1  ;;  %436 = vst.msk [vmem:[#allocation4 + $0x78] sm:$0xff] %vm420_vm1, %v2181_v1 }
  0x2e PF: > { %v437_v2 = vld [vmem:[%s2270_s13] sm:$0xf]  ;;  %vm521_vm2 = vcmask 1043456   ;;  %vm472_vm3 = vcmask 31744   ;;  %v2182_v25 = vmov 0   ;;  %v2408_v37 = vld [vmem:[#allocation2 + $0x8] sm:$0xff] }
  0x2f   : > { %440 = vxpose.xlu0.b32.start.end [1/1] (short) %v437_v2, 128  ;;  %v438_v3 = vld [vmem:[%s2286_s29] sm:$0xf]  ;;  %2024 = vset.pattern.permute.xlu1 %v2182_v25  ;;  %vm990_vm4 = vcmask 7168   ;;  %v673_v43 = vld [vmem:[#allocation2 + $0x18] sm:$0xff]  ;;  %v2417_v46 = vld [vmem:[#allocation2 + $0x10] sm:$0xff]  ;;  %p1770_p10 = scmp.ne.s32.totalorder %s2154_s21, 1 }
  0x30   : > { %1841 = vmatprep.subr.msk.mxu0 %vm521_vm2, %v438_v3  ;;  %v670_v38 = vld [vmem:[#allocation2] sm:$0xff]  ;;  %v675_v49 = vld [vmem:[#allocation2 + $0x28] sm:$0xff]  ;;  %v677_v57 = vld [vmem:[#allocation2 + $0x38] sm:$0xff]  ;;  %vm2185_vm5 = vmmov (!%p1770_p10), 0  }
  0x31   : > { %1842 = vmatpush3.msk.msra.mxu0 %vm521_vm2, %v438_v3  ;;  %v2426_v52 = vld [vmem:[#allocation2 + $0x20] sm:$0xff]  ;;  %v2436_v62 = vld [vmem:[#allocation2 + $0x30] sm:$0xff]  ;;  %v679_v3 = vld [vmem:[#allocation2 + $0x48] sm:$0xff] }
  0x32   : > { %v439_v53 = vld [vmem:[%s2291_s12] sm:$0xf]  ;;  %vm2659_vm6 = vmpackc.low (!%p1770_p10), %vm472_vm3, %vm472_vm3 }
  0x33   : > { %1867 = vmatprep.subr.mxu1 %v439_v53 }
  0x34   : > { %1868 = vmatpush3.xpose.msra.mxu1 %v439_v53 }
  0x58   : > { %2025 = vset.pattern.permute.xlu0 %v2182_v25 }
  0xaf   : > { %v456_v4 = vpop.trf.xlu0 }
  0xb0   : > { %1843 = vmatprep.mubr.msk.f32.mxu0 %vm472_vm3, %v456_v4 }
  0xb3   : > { %v457_v5 = vpop.trf.xlu0 }
  0xb4   : > { %1844 = vmatmul.mubr.msk.f32.vlgmr.msra.gmra.mrb[0].mxu0 %vm472_vm3, %v457_v5 }
  0xb7   : > { %v458_v6 = vpop.trf.xlu0 }
  0xb8   : > { %1846 = vmatprep.mubr.msk.f32.mxu0 %vm472_vm3, %v458_v6 }
  0xbb   : > { %v459_v7 = vpop.trf.xlu0 }
  0xbc   : > { %1847 = vmatmul.mubr.msk.f32.gmra.mrb[2].mxu0 %vm472_vm3, %v459_v7 }
  0xbf   : > { %v460_v8 = vpop.trf.xlu0 }
  0xc0   : > { %1849 = vmatprep.mubr.msk.f32.mxu0 %vm472_vm3, %v460_v8  ;;  %v2445_v8 = vld [vmem:[#allocation2 + $0x40] sm:$0xff] }
  0xc3   : > { %v461_v9 = vpop.trf.xlu0 }
  0xc4   : > { %1850 = vmatmul.mubr.msk.f32.gmra.mrb[4].mxu0 %vm472_vm3, %v461_v9 }
  0xc7   : > { %v462_v10 = vpop.trf.xlu0 }
  0xc8   : > { %1852 = vmatprep.mubr.msk.f32.mxu0 %vm472_vm3, %v462_v10 }
  0xcb   : > { %v463_v11 = vpop.trf.xlu0 }
  0xcc   : > { %1853 = vmatmul.mubr.msk.f32.gmra.mrb[6].mxu0 %vm472_vm3, %v463_v11 }
  0xcf   : > { %v464_v12 = vpop.trf.xlu0 }
  0xd0   : > { %1855 = vmatprep.mubr.msk.f32.mxu0 %vm472_vm3, %v464_v12 }
  0xd3   : > { %v465_v13 = vpop.trf.xlu0 }
  0xd4   : > { %1856 = vmatmul.mubr.msk.f32.gmra.mrb[8].mxu0 %vm472_vm3, %v465_v13 }
  0xd7   : > { %v466_v14 = vpop.trf.xlu0 }
  0xd8   : > { %1858 = vmatprep.mubr.msk.f32.mxu0 %vm472_vm3, %v466_v14  ;;  %v681_v14 = vld [vmem:[#allocation2 + $0x58] sm:$0xff] }
  0xdb   : > { %v467_v15 = vpop.trf.xlu0 }
  0xdc   : > { %1859 = vmatmul.mubr.msk.f32.gmra.mrb[10].mxu0 %vm472_vm3, %v467_v15 }
  0xdf   : > { %v468_v16 = vpop.trf.xlu0 }
  0xe0   : > { %1861 = vmatprep.mubr.msk.f32.mxu0 %vm472_vm3, %v468_v16 }
  0xe3   : > { %v469_v17 = vpop.trf.xlu0 }
  0xe4   : > { %1862 = vmatmul.mubr.msk.f32.gmra.mrb[12].mxu0 %vm472_vm3, %v469_v17 }
  0xe7   : > { %v470_v18 = vpop.trf.xlu0 }
  0xe8   : > { %1864 = vmatprep.mubr.msk.f32.mxu0 %vm472_vm3, %v470_v18 }
  0xeb   : > { %v471_v19 = vpop.trf.xlu0 }
  0xec   : > { %1865 = vmatmul.mubr.msk.f32.gmra.mrb[14].mxu0 %vm472_vm3, %v471_v19  ;;  %v2459_v19 = vld [vmem:[#allocation2 + $0x50] sm:$0xff] }
 0x187   : > { %v2360_v20 = vpop.f32.mrb[0].mxu0 }
 0x188   : > { %688 = vmax.xlane.f32.xlu1 %v2360_v20  ;;  %v2363_v21 = vpop.f32.mrb[1].mxu0 }
 0x189   : > { %686 = vmax.xlane.f32.xlu0 %v2363_v21 }
 0x18f   : > { %v2366_v22 = vpop.f32.mrb[2].mxu0 }
 0x190   : > { %692 = vmax.xlane.f32.xlu1 %v2366_v22  ;;  %v2369_v23 = vpop.f32.mrb[3].mxu0 }
 0x194   : > { %690 = vmax.xlane.f32.xlu1 %v2369_v23 }
 0x197   : > { %v2372_v24 = vpop.f32.mrb[4].mxu0 }
 0x198   : > { %696 = vmax.xlane.f32.xlu1 %v2372_v24  ;;  %v2375_v26 = vpop.f32.mrb[5].mxu0 }
 0x19c   : > { %694 = vmax.xlane.f32.xlu1 %v2375_v26 }
 0x19f   : > { %v2378_v27 = vpop.f32.mrb[6].mxu0 }
 0x1a0   : > { %700 = vmax.xlane.f32.xlu1 %v2378_v27  ;;  %v2381_v28 = vpop.f32.mrb[7].mxu0 }
 0x1a4   : > { %698 = vmax.xlane.f32.xlu1 %v2381_v28 }
 0x1a7   : > { %v2384_v29 = vpop.f32.mrb[8].mxu0 }
 0x1a8   : > { %704 = vmax.xlane.f32.xlu1 %v2384_v29  ;;  %v2387_v30 = vpop.f32.mrb[9].mxu0 }
 0x1ac   : > { %702 = vmax.xlane.f32.xlu1 %v2387_v30 }
 0x1af   : > { %v2390_v31 = vpop.f32.mrb[10].mxu0 }
 0x1b0   : > { %708 = vmax.xlane.f32.xlu1 %v2390_v31  ;;  %v2393_v32 = vpop.f32.mrb[11].mxu0 }
 0x1b4   : > { %706 = vmax.xlane.f32.xlu1 %v2393_v32 }
 0x1b7   : > { %v2396_v33 = vpop.f32.mrb[12].mxu0 }
 0x1b8   : > { %712 = vmax.xlane.f32.xlu1 %v2396_v33  ;;  %v2399_v34 = vpop.f32.mrb[13].mxu0 }
 0x1bc   : > { %710 = vmax.xlane.f32.xlu1 %v2399_v34 }
 0x1bf   : > { %v2402_v35 = vpop.f32.mrb[14].mxu0 }
 0x1c0   : > { %716 = vmax.xlane.f32.xlu1 %v2402_v35  ;;  %v2405_v36 = vpop.f32.mrb[15].mxu0 }
 0x1c4   : > { %714 = vmax.xlane.f32.xlu1 %v2405_v36 }
 0x215   : > { %v689_v39 = vpop.xlane.xlu1 %688 }
 0x216   : > { %v2411_v40 = vmax.f32 %v2408_v37, %v689_v39  ;;  %v687_v41 = vpop.xlane.xlu0 %686 }
 0x217   : > { %v718_v42 = vmax.f32 %v670_v38, %v687_v41 }
 0x218   : > { %1297 = vst.msk [vmem:[#allocation2 + $0x8] sm:$0xff] %vm990_vm4, %v2411_v40  ;;  %789 = vperm.xlu1 %2024, %v2411_v40  }
 0x219   : > { %1296 = vst.msk [vmem:[#allocation2] sm:$0xff] %vm990_vm4, %v718_v42  ;;  %v734_v54 = vsub.f32 %v670_v38, %v718_v42 }
 0x21b   : > { %v750_v58 = vmul.f32 1.442695, %v734_v54 }
 0x21c   : > { %784 = vperm.xlu1 %2024, %v718_v42  }
 0x21d   : > { %v693_v44 = vpop.xlane.xlu1 %692  ;;  %2026 = vpow2.f32 %v750_v58  ;;  %v2476_v58 = vld [vmem:[#allocation2 + $0x78] sm:$0xff] }
 0x21e   : > { %v721_v45 = vmax.f32 %v673_v43, %v693_v44 }
 0x220   : > { %1299 = vst.msk [vmem:[#allocation2 + $0x18] sm:$0xff] %vm990_vm4, %v721_v45  ;;  %799 = vperm.xlu1 %2024, %v721_v45   ;;  %v737_v59 = vsub.f32 %v673_v43, %v721_v45  ;;  %v683_v43 = vld [vmem:[#allocation2 + $0x68] sm:$0xff] }
 0x221   : > { %v691_v47 = vpop.xlane.xlu1 %690 }
 0x222   : > { %v2421_v48 = vmax.f32 %v2417_v46, %v691_v47  ;;  %v756_v63 = vmul.f32 1.442695, %v737_v59 }
 0x224   : > { %1298 = vst.msk [vmem:[#allocation2 + $0x10] sm:$0xff] %vm990_vm4, %v2421_v48  ;;  %794 = vperm.xlu1 %2024, %v2421_v48   ;;  %2028 = vpow2.f32 %v756_v63 }
 0x225   : > { %v697_v50 = vpop.xlane.xlu1 %696 }
 0x226   : > { %v723_v51 = vmax.f32 %v675_v49, %v697_v50 }
 0x227   : > { %v2451_v13 = vpop.eup %2026 }
 0x228   : > { %1301 = vst.msk [vmem:[#allocation2 + $0x28] sm:$0xff] %vm990_vm4, %v723_v51  ;;  %809 = vperm.xlu1 %2024, %v723_v51   ;;  %v739_v0 = vsub.f32 %v675_v49, %v723_v51  ;;  %v682_v49 = vld [vmem:[#allocation2 + $0x60] sm:$0xff]  ;;  %v735_v51 = vsub.f32 %v2408_v37, %v2411_v40  ;;  %v2487_v40 = vld [vmem:[#allocation2 + $0x70] sm:$0xff] }
 0x229   : > { %v695_v55 = vpop.xlane.xlu1 %694 }
 0x22a   : > { %v2431_v56 = vmax.f32 %v2426_v52, %v695_v55  ;;  %v760_v4 = vmul.f32 1.442695, %v739_v0  ;;  %v752_v59 = vmul.f32 1.442695, %v735_v51 }
 0x22c   : > { %1300 = vst.msk [vmem:[#allocation2 + $0x20] sm:$0xff] %vm990_vm4, %v2431_v56  ;;  %804 = vperm.xlu1 %2024, %v2431_v56   ;;  %2030 = vpow2.f32 %v760_v4 }
 0x22d   : > { %v701_v60 = vpop.xlane.xlu1 %700 }
 0x22e   : > { %v725_v61 = vmax.f32 %v677_v57, %v701_v60  ;;  %v2457_v18 = vpop.eup %2028  ;;  %v736_v60 = vsub.f32 %v2417_v46, %v2421_v48  ;;  %v738_v46 = vsub.f32 %v2426_v52, %v2431_v56 }
 0x230   : > { %1303 = vst.msk [vmem:[#allocation2 + $0x38] sm:$0xff] %vm990_vm4, %v725_v61  ;;  %819 = vperm.xlu1 %2024, %v725_v61   ;;  %v741_v5 = vsub.f32 %v677_v57, %v725_v61 }
 0x231   : > { %v699_v1 = vpop.xlane.xlu1 %698 }
 0x232   : > { %v2440_v2 = vmax.f32 %v2436_v62, %v699_v1  ;;  %v764_v9 = vmul.f32 1.442695, %v741_v5  ;;  %v754_v1 = vmul.f32 1.442695, %v736_v60  ;;  %v758_v5 = vmul.f32 1.442695, %v738_v46 }
 0x234   : > { %1302 = vst.msk [vmem:[#allocation2 + $0x30] sm:$0xff] %vm990_vm4, %v2440_v2  ;;  %814 = vperm.xlu1 %2024, %v2440_v2   ;;  %2032 = vpow2.f32 %v764_v9 }
 0x235   : > { %v705_v6 = vpop.xlane.xlu1 %704 }
 0x236   : > { %v727_v7 = vmax.f32 %v679_v3, %v705_v6  ;;  %v2464_v42 = vpop.eup %2030  ;;  %v740_v6 = vsub.f32 %v2436_v62, %v2440_v2 }
 0x238   : > { %1305 = vst.msk [vmem:[#allocation2 + $0x48] sm:$0xff] %vm990_vm4, %v727_v7  ;;  %829 = vperm.xlu0 %2025, %v727_v7   ;;  %v743_v10 = vsub.f32 %v679_v3, %v727_v7  ;;  %v762_v52 = vmul.f32 1.442695, %v740_v6 }
 0x239   : > { %v703_v11 = vpop.xlane.xlu1 %702 }
 0x23a   : > { %v2449_v12 = vmax.f32 %v2445_v8, %v703_v11  ;;  %v768_v15 = vmul.f32 1.442695, %v743_v10 }
 0x23c   : > { %1304 = vst.msk [vmem:[#allocation2 + $0x40] sm:$0xff] %vm990_vm4, %v2449_v12  ;;  %824 = vperm.xlu1 %2024, %v2449_v12   ;;  %1025 = vperm.xlu0 %2025, %v2451_v13   ;;  %2034 = vpow2.f32 %v768_v15  ;;  %v742_v56 = vsub.f32 %v2445_v8, %v2449_v12 }
 0x23d   : > { %v709_v16 = vpop.xlane.xlu1 %708 }
 0x23e   : > { %v729_v17 = vmax.f32 %v681_v14, %v709_v16  ;;  %v2468_v47 = vpop.eup %2032  ;;  %v766_v10 = vmul.f32 1.442695, %v742_v56 }
 0x240   : > { %v745_v25 = vsub.f32 %v681_v14, %v729_v17  ;;  %1307 = vst.msk [vmem:[#allocation2 + $0x58] sm:$0xff] %vm990_vm4, %v729_v17  ;;  %839 = vperm.xlu1 %2024, %v729_v17   ;;  %1040 = vperm.xlu0 %2025, %v2457_v18  }
 0x241   : > { %v707_v38 = vpop.xlane.xlu1 %706 }
 0x242   : > { %v772_v39 = vmul.f32 1.442695, %v745_v25  ;;  %v728_v41 = vmax.f32 %v2459_v19, %v707_v38 }
 0x244   : > { %2036 = vpow2.f32 %v772_v39  ;;  %1306 = vst.msk [vmem:[#allocation2 + $0x50] sm:$0xff] %vm990_vm4, %v728_v41  ;;  %834 = vperm.xlu1 %2024, %v728_v41   ;;  %1050 = vperm.xlu0 %2025, %v2464_v42   ;;  %v744_v11 = vsub.f32 %v2459_v19, %v728_v41 }
 0x245   : > { %v713_v44 = vpop.xlane.xlu1 %712 }
 0x246   : > { %v731_v45 = vmax.f32 %v683_v43, %v713_v44  ;;  %v2474_v57 = vpop.eup %2034  ;;  %v770_v2 = vmul.f32 1.442695, %v744_v11 }
 0x248   : > { %v747_v50 = vsub.f32 %v683_v43, %v731_v45  ;;  %1309 = vst.msk [vmem:[#allocation2 + $0x68] sm:$0xff] %vm990_vm4, %v731_v45  ;;  %849 = vperm.xlu1 %2024, %v731_v45   ;;  %1060 = vperm.xlu0 %2025, %v2468_v47  }
 0x249   : > { %v711_v53 = vpop.xlane.xlu1 %710 }
 0x24a   : > { %v776_v54 = vmul.f32 1.442695, %v747_v50  ;;  %v730_v55 = vmax.f32 %v682_v49, %v711_v53 }
 0x24c   : > { %2038 = vpow2.f32 %v776_v54  ;;  %1308 = vst.msk [vmem:[#allocation2 + $0x60] sm:$0xff] %vm990_vm4, %v730_v55  ;;  %844 = vperm.xlu1 %2024, %v730_v55   ;;  %1070 = vperm.xlu0 %2025, %v2474_v57   ;;  %v746_v14 = vsub.f32 %v682_v49, %v730_v55 }
 0x24d   : > { %v717_v61 = vpop.xlane.xlu1 %716  ;;  %2040 = vpow2.f32 %v752_v59 }
 0x24e   : > { %v2482_v63 = vpop.eup %2036  ;;  %v2485_v37 = vmax.f32 %v2476_v58, %v717_v61  ;;  %2042 = vpow2.f32 %v754_v1  ;;  %v774_v8 = vmul.f32 1.442695, %v746_v14 }
 0x24f   : > { %2044 = vpow2.f32 %v758_v5 }
 0x250   : > { %v749_v0 = vsub.f32 %v2476_v58, %v2485_v37  ;;  %1311 = vst.msk [vmem:[#allocation2 + $0x78] sm:$0xff] %vm990_vm4, %v2485_v37  ;;  %1080 = vperm.xlu0 %2025, %v2482_v63   ;;  %2046 = vpow2.f32 %v762_v52 }
 0x251   : > { %v715_v48 = vpop.xlane.xlu1 %714  ;;  %2048 = vpow2.f32 %v766_v10 }
 0x252   : > { %v2497_v3 = vmax.f32 %v2487_v40, %v715_v48  ;;  %2050 = vpow2.f32 %v770_v2 }
 0x253   : > { %2052 = vpow2.f32 %v774_v8 }
 0x254   : > { %v748_v4 = vsub.f32 %v2487_v40, %v2497_v3  ;;  %1310 = vst.msk [vmem:[#allocation2 + $0x70] sm:$0xff] %vm990_vm4, %v2497_v3  ;;  %854 = vperm.xlu1 %2024, %v2497_v3  }
 0x256   : > { %v2506_v7 = vpop.eup %2038 }
 0x257   : > { %1090 = vperm.xlu0 %2025, %v2506_v7   ;;  %v2512_v9 = vpop.eup %2040 }
 0x258   : > { %859 = vperm.xlu1 %2024, %v2485_v37   ;;  %v2516_v62 = vpop.eup %2042 }
 0x259   : > { %v2519_v15 = vpop.eup %2044 }
 0x25a   : > { %v2522_v12 = vpop.eup %2046 }
 0x25b   : > { %v2525_v16 = vpop.eup %2048 }
 0x25c   : > { %1030 = vperm.xlu1 %2024, %v2512_v9   ;;  %v2528_v17 = vpop.eup %2050 }
 0x25d   : > { %v2531_v19 = vpop.eup %2052 }
 0x260   : > { %1035 = vperm.xlu1 %2024, %v2516_v62  }
 0x264   : > { %1045 = vperm.xlu1 %2024, %v2519_v15  }
 0x268   : > { %1055 = vperm.xlu1 %2024, %v2522_v12  }
 0x26c   : > { %1065 = vperm.xlu1 %2024, %v2525_v16  }
 0x270   : > { %1075 = vperm.xlu1 %2024, %v2528_v17  }
 0x274   : > { %1085 = vperm.xlu1 %2024, %v2531_v19  }
 0x297   : > { %v790_v25 = vpop.permute.xlu1 %789 }
 0x298   : > { %v863_v38 = vsub.f32 %v2360_v20, %v790_v25 }
 0x29a   : > { %v880_v39 = vmul.f32 1.442695, %v863_v38 }
 0x29b   : > { %v785_v41 = vpop.permute.xlu1 %784 }
 0x29c   : > { %2054 = vpow2.f32 %v880_v39  ;;  %v862_v43 = vsub.f32 %v2363_v21, %v785_v41 }
 0x29e   : > { %v878_v44 = vmul.f32 1.442695, %v862_v43 }
 0x29f   : > { %v800_v45 = vpop.permute.xlu1 %799 }
 0x2a0   : > { %2056 = vpow2.f32 %v878_v44  ;;  %v865_v49 = vsub.f32 %v2366_v22, %v800_v45 }
 0x2a2   : > { %v884_v50 = vmul.f32 1.442695, %v865_v49 }
 0x2a3   : > { %v795_v51 = vpop.permute.xlu1 %794 }
 0x2a4   : > { %2058 = vpow2.f32 %v884_v50  ;;  %v864_v53 = vsub.f32 %v2369_v23, %v795_v51 }
 0x2a6   : > { %v2055_v54 = vpop.eup %2054  ;;  %v882_v55 = vmul.f32 1.442695, %v864_v53 }
 0x2a7   : > { %v810_v59 = vpop.permute.xlu1 %809  ;;  %944 = vadd.xlane.f32.xlu0 %v2055_v54 }
 0x2a8   : > { %2060 = vpow2.f32 %v882_v55  ;;  %v867_v20 = vsub.f32 %v2372_v24, %v810_v59 }
 0x2aa   : > { %v2057_v60 = vpop.eup %2056  ;;  %v888_v61 = vmul.f32 1.442695, %v867_v20 }
 0x2ab   : > { %942 = vadd.xlane.f32.xlu1 %v2057_v60  ;;  %1869 = vmatprep.mubr.f32.mxu1 %v2057_v60  ;;  %v805_v21 = vpop.permute.xlu1 %804 }
 0x2ac   : > { %2062 = vpow2.f32 %v888_v61  ;;  %v866_v22 = vsub.f32 %v2375_v26, %v805_v21  ;;  %1870 = vmatmul.mubr.f32.vlgmr.msra.gmra.mrb[0].mxu1 %v2055_v54 }
 0x2ae   : > { %v2059_v1 = vpop.eup %2058  ;;  %v886_v46 = vmul.f32 1.442695, %v866_v22 }
 0x2af   : > { %948 = vadd.xlane.f32.xlu1 %v2059_v1  ;;  %v820_v23 = vpop.permute.xlu1 %819 }
 0x2b0   : > { %2064 = vpow2.f32 %v886_v46  ;;  %v869_v48 = vsub.f32 %v2378_v27, %v820_v23 }
 0x2b2   : > { %v2061_v5 = vpop.eup %2060  ;;  %v892_v6 = vmul.f32 1.442695, %v869_v48 }
 0x2b3   : > { %946 = vadd.xlane.f32.xlu1 %v2061_v5  ;;  %1872 = vmatprep.mubr.f32.mxu1 %v2061_v5  ;;  %v815_v24 = vpop.permute.xlu1 %814 }
 0x2b4   : > { %2066 = vpow2.f32 %v892_v6  ;;  %v868_v52 = vsub.f32 %v2381_v28, %v815_v24  ;;  %1873 = vmatmul.mubr.f32.gmra.mrb[2].mxu1 %v2059_v1 }
 0x2b6   : > { %v2063_v56 = vpop.eup %2062  ;;  %v890_v10 = vmul.f32 1.442695, %v868_v52 }
 0x2b7   : > { %952 = vadd.xlane.f32.xlu1 %v2063_v56  ;;  %v830_v26 = vpop.permute.xlu0 %829 }
 0x2b8   : > { %2068 = vpow2.f32 %v890_v10  ;;  %v871_v11 = vsub.f32 %v2384_v29, %v830_v26 }
 0x2ba   : > { %v2065_v2 = vpop.eup %2064  ;;  %v896_v14 = vmul.f32 1.442695, %v871_v11 }
 0x2bb   : > { %950 = vadd.xlane.f32.xlu1 %v2065_v2  ;;  %1875 = vmatprep.mubr.f32.mxu1 %v2065_v2  ;;  %v825_v27 = vpop.permute.xlu1 %824  ;;  %v2562_v6 = vpop.permute.xlu0 %1025  ;;  %v911_v2 = vld [vmem:[#allocation3 + $0x8] sm:$0xff] }
 0x2bc   : > { %2070 = vpow2.f32 %v896_v14  ;;  %v870_v8 = vsub.f32 %v2387_v30, %v825_v27  ;;  %1876 = vmatmul.mubr.f32.gmra.mrb[4].mxu1 %v2063_v56  ;;  %v927_v14 = vmul.f32 %v2512_v9, %v911_v2 }
 0x2be   : > { %v2067_v25 = vpop.eup %2066  ;;  %v894_v38 = vmul.f32 1.442695, %v870_v8 }
 0x2bf   : > { %956 = vadd.xlane.f32.xlu1 %v2067_v25  ;;  %v840_v28 = vpop.permute.xlu1 %839  ;;  %v2566_v40 = vpop.permute.xlu0 %1040 }
 0x2c0   : > { %2072 = vpow2.f32 %v894_v38  ;;  %v873_v39 = vsub.f32 %v2390_v31, %v840_v28 }
 0x2c2   : > { %v2069_v41 = vpop.eup %2068  ;;  %v900_v43 = vmul.f32 1.442695, %v873_v39 }
 0x2c3   : > { %1878 = vmatprep.mubr.f32.mxu1 %v2069_v41  ;;  %v835_v29 = vpop.permute.xlu1 %834  ;;  %954 = vadd.xlane.f32.xlu0 %v2069_v41  ;;  %v2570_v58 = vpop.permute.xlu0 %1050  ;;  %v913_v41 = vld [vmem:[#allocation3 + $0x18] sm:$0xff] }
 0x2c4   : > { %2074 = vpow2.f32 %v900_v43  ;;  %v872_v44 = vsub.f32 %v2393_v32, %v835_v29  ;;  %1879 = vmatmul.mubr.f32.gmra.mrb[6].mxu1 %v2067_v25  ;;  %v910_v25 = vld [vmem:[#allocation3] sm:$0xff]  ;;  %v929_v29 = vmul.f32 %v2457_v18, %v913_v41 }
 0x2c5   : > { %v926_v28 = vmul.f32 %v2451_v13, %v910_v25  ;;  %v922_v41 = vld [vmem:[#allocation3 + $0x60] sm:$0xff] }
 0x2c6   : > { %v2071_v45 = vpop.eup %2070  ;;  %v898_v49 = vmul.f32 1.442695, %v872_v44 }
 0x2c7   : > { %v850_v30 = vpop.permute.xlu1 %849  ;;  %960 = vadd.xlane.f32.xlu1 %v2071_v45 }
 0x2c8   : > { %2076 = vpow2.f32 %v898_v49  ;;  %v875_v50 = vsub.f32 %v2396_v33, %v850_v30 }
 0x2ca   : > { %v2073_v51 = vpop.eup %2072  ;;  %v904_v53 = vmul.f32 1.442695, %v875_v50  ;;  %v915_v50 = vld [vmem:[#allocation3 + $0x28] sm:$0xff] }
 0x2cb   : > { %1881 = vmatprep.mubr.f32.mxu1 %v2073_v51  ;;  %v845_v31 = vpop.permute.xlu1 %844  ;;  %958 = vadd.xlane.f32.xlu0 %v2073_v51  ;;  %v931_v13 = vmul.f32 %v2464_v42, %v915_v50 }
 0x2cc   : > { %2078 = vpow2.f32 %v904_v53  ;;  %v874_v54 = vsub.f32 %v2399_v34, %v845_v31  ;;  %1882 = vmatmul.mubr.f32.gmra.mrb[8].mxu1 %v2071_v45  ;;  %v912_v45 = vld [vmem:[#allocation3 + $0x10] sm:$0xff]  ;;  %v914_v31 = vld [vmem:[#allocation3 + $0x20] sm:$0xff] }
 0x2cd   : > { %v928_v9 = vmul.f32 %v2516_v62, %v912_v45  ;;  %v930_v18 = vmul.f32 %v2519_v15, %v914_v31  ;;  %v924_v45 = vld [vmem:[#allocation3 + $0x70] sm:$0xff] }
 0x2ce   : > { %v2075_v55 = vpop.eup %2074  ;;  %v902_v59 = vmul.f32 1.442695, %v874_v54 }
 0x2cf   : > { %964 = vadd.xlane.f32.xlu1 %v2075_v55 }
 0x2d0   : > { %2080 = vpow2.f32 %v902_v59  ;;  %v917_v59 = vld [vmem:[#allocation3 + $0x38] sm:$0xff] }
 0x2d1   : > { %v933_v62 = vmul.f32 %v2468_v47, %v917_v59  ;;  %v1010_v59 = vld [vmem:[#allocation4 + $0x18] sm:$0xff] }
 0x2d2   : > { %v2077_v32 = vpop.eup %2076 }
 0x2d3   : > { %v855_v20 = vpop.permute.xlu1 %854  ;;  %962 = vadd.xlane.f32.xlu0 %v2077_v32  ;;  %1884 = vmatprep.mubr.f32.mxu1 %v2077_v32 }
 0x2d4   : > { %v876_v60 = vsub.f32 %v2405_v36, %v855_v20  ;;  %1885 = vmatmul.mubr.f32.gmra.mrb[10].mxu1 %v2075_v55  ;;  %v778_v36 = vmul.f32 1.442695, %v748_v4 }
 0x2d6   : > { %v2079_v33 = vpop.eup %2078  ;;  %v906_v61 = vmul.f32 1.442695, %v876_v60  ;;  %v916_v60 = vld [vmem:[#allocation3 + $0x30] sm:$0xff] }
 0x2d7   : > { %v860_v21 = vpop.permute.xlu1 %859  ;;  %968 = vadd.xlane.f32.xlu1 %v2079_v33  ;;  %v932_v42 = vmul.f32 %v2522_v12, %v916_v60 }
 0x2d8   : > { %2082 = vpow2.f32 %v906_v61  ;;  %v877_v22 = vsub.f32 %v2402_v35, %v860_v21  ;;  %v780_v35 = vmul.f32 1.442695, %v749_v0  ;;  %v2574_v0 = vpop.permute.xlu0 %1060  ;;  %v919_v21 = vld [vmem:[#allocation3 + $0x48] sm:$0xff] }
 0x2d9   : > { %v935_v15 = vmul.f32 %v2474_v57, %v919_v21 }
 0x2da   : > { %v2081_v34 = vpop.eup %2080  ;;  %v908_v1 = vmul.f32 1.442695, %v877_v22 }
 0x2db   : > { %966 = vadd.xlane.f32.xlu0 %v2081_v34  ;;  %1887 = vmatprep.mubr.f32.mxu1 %v2081_v34  ;;  %v2564_v24 = vpop.permute.xlu1 %1030 }
 0x2dc   : > { %2084 = vpow2.f32 %v908_v1  ;;  %1888 = vmatmul.mubr.f32.gmra.mrb[12].mxu1 %v2079_v33  ;;  %v2578_v52 = vpop.permute.xlu0 %1070  ;;  %v918_v1 = vld [vmem:[#allocation3 + $0x40] sm:$0xff] }
 0x2dd   : > { %2086 = vpow2.f32 %v778_v36  ;;  %v934_v47 = vmul.f32 %v2525_v16, %v918_v1  ;;  %v921_v36 = vld [vmem:[#allocation3 + $0x58] sm:$0xff]  ;;  %v1013_v1 = vld [vmem:[#allocation4 + $0x30] sm:$0xff] }
 0x2de   : > { %2088 = vpow2.f32 %v780_v35  ;;  %v937_v12 = vmul.f32 %v2482_v63, %v921_v36  ;;  %v938_v63 = vmul.f32 %v2531_v19, %v922_v41  ;;  %v1007_v19 = vld [vmem:[#allocation4] sm:$0xff] }
 0x2df   : > { %v2568_v3 = vpop.permute.xlu1 %1035  ;;  %v1103_v31 = vmul.f32 %v2562_v6, %v1007_v19  ;;  %v1012_v6 = vld [vmem:[#allocation4 + $0x28] sm:$0xff] }
 0x2e0   : > { %v2582_v10 = vpop.permute.xlu0 %1080 }
 0x2e2   : > { %v2083_v46 = vpop.eup %2082 }
 0x2e3   : > { %970 = vadd.xlane.f32.xlu0 %v2083_v46  ;;  %1890 = vmatprep.mubr.f32.mxu1 %v2083_v46  ;;  %v2572_v37 = vpop.permute.xlu1 %1045 }
 0x2e4   : > { %v2586_v11 = vpop.permute.xlu0 %1090 }
 0x2e6   : > { %v2085_v23 = vpop.eup %2084 }
 0x2e7   : > { %972 = vadd.xlane.f32.xlu1 %v2085_v23  ;;  %1891 = vmatmul.mubr.f32.gmra.mrb[14].mxu1 %v2085_v23  ;;  %v2556_v48 = vpop.eup %2086  ;;  %v2576_v4 = vpop.permute.xlu1 %1055 }
 0x2e8   : > { %v2558_v5 = vpop.eup %2088 }
 0x2eb   : > { %v2580_v56 = vpop.permute.xlu1 %1065 }
 0x2ef   : > { %v2584_v26 = vpop.permute.xlu1 %1075 }
 0x2f3   : > { %v2589_v27 = vpop.permute.xlu1 %1085 }
 0x2f8   : > { %1095 = vperm.xlu1 %2024, %v2556_v48  }
 0x2f9   : > { %1100 = vperm.xlu0 %2025, %v2558_v5  }
 0x334   : > { %v945_v8 = vpop.xlane.xlu0 %944 }
 0x335   : > { %v975_v38 = vadd.f32 %v945_v8, %v927_v14  ;;  %v920_v14 = vld [vmem:[#allocation3 + $0x50] sm:$0xff] }
 0x336   : > { %v936_v57 = vmul.f32 %v2528_v17, %v920_v14  ;;  %v940_v17 = vmul.f32 %v2556_v48, %v924_v45 }
 0x337   : > { %992 = vst.msk [vmem:[#allocation3 + $0x8] sm:$0xff] %vm990_vm4, %v975_v38  ;;  %v923_v38 = vld [vmem:[#allocation3 + $0x68] sm:$0xff] }
 0x338   : > { %v943_v39 = vpop.xlane.xlu1 %942  ;;  %v939_v16 = vmul.f32 %v2506_v7, %v923_v38  ;;  %v1017_v38 = vld [vmem:[#allocation4 + $0x50] sm:$0xff] }
 0x339   : > { %v974_v43 = vadd.f32 %v943_v39, %v926_v28 }
 0x33b   : > { %991 = vst.msk [vmem:[#allocation3] sm:$0xff] %vm990_vm4, %v974_v43 }
 0x33c   : > { %v949_v44 = vpop.xlane.xlu1 %948 }
 0x33d   : > { %v977_v49 = vadd.f32 %v949_v44, %v929_v29 }
 0x33f   : > { %994 = vst.msk [vmem:[#allocation3 + $0x18] sm:$0xff] %vm990_vm4, %v977_v49 }
 0x340   : > { %v947_v30 = vpop.xlane.xlu1 %946 }
 0x341   : > { %v976_v51 = vadd.f32 %v947_v30, %v928_v9  ;;  %v925_v9 = vld [vmem:[#allocation3 + $0x78] sm:$0xff] }
 0x342   : > { %v941_v7 = vmul.f32 %v2558_v5, %v925_v9  ;;  %v1009_v5 = vld [vmem:[#allocation4 + $0x10] sm:$0xff] }
 0x343   : > { %993 = vst.msk [vmem:[#allocation3 + $0x10] sm:$0xff] %vm990_vm4, %v976_v51 }
 0x344   : > { %v953_v53 = vpop.xlane.xlu1 %952 }
 0x345   : > { %v979_v54 = vadd.f32 %v953_v53, %v931_v13  ;;  %v1008_v13 = vld [vmem:[#allocation4 + $0x8] sm:$0xff] }
 0x346   : > { %v1104_v53 = vmul.f32 %v2564_v24, %v1008_v13 }
 0x347   : > { %996 = vst.msk [vmem:[#allocation3 + $0x28] sm:$0xff] %vm990_vm4, %v979_v54 }
 0x348   : > { %v951_v55 = vpop.xlane.xlu1 %950 }
 0x349   : > { %v978_v32 = vadd.f32 %v951_v55, %v930_v18 }
 0x34b   : > { %995 = vst.msk [vmem:[#allocation3 + $0x20] sm:$0xff] %vm990_vm4, %v978_v32  ;;  %v1106_v32 = vmul.f32 %v2566_v40, %v1010_v59 }
 0x34c   : > { %v957_v20 = vpop.xlane.xlu1 %956 }
 0x34d   : > { %v981_v33 = vadd.f32 %v957_v20, %v933_v62  ;;  %v1105_v62 = vmul.f32 %v2568_v3, %v1009_v5  ;;  %v1014_v3 = vld [vmem:[#allocation4 + $0x38] sm:$0xff] }
 0x34f   : > { %998 = vst.msk [vmem:[#allocation3 + $0x38] sm:$0xff] %vm990_vm4, %v981_v33 }
 0x350   : > { %v955_v61 = vpop.xlane.xlu0 %954 }
 0x351   : > { %v980_v22 = vadd.f32 %v955_v61, %v932_v42  ;;  %v1011_v42 = vld [vmem:[#allocation4 + $0x20] sm:$0xff]  ;;  %v1108_v61 = vmul.f32 %v2570_v58, %v1012_v6 }
 0x352   : > { %v1107_v21 = vmul.f32 %v2572_v37, %v1011_v42  ;;  %v1016_v37 = vld [vmem:[#allocation4 + $0x48] sm:$0xff]  ;;  %v1336_v59 = vld [vmem:[#allocation3 + $0x20] sm:$0xff] (!%p1770_p10) }
 0x353   : > { %997 = vst.msk [vmem:[#allocation3 + $0x30] sm:$0xff] %vm990_vm4, %v980_v22 }
 0x354   : > { %v961_v34 = vpop.xlane.xlu1 %960 }
 0x355   : > { %v983_v46 = vadd.f32 %v961_v34, %v935_v15 }
 0x356   : > { %v1339_v5 = vld [vmem:[#allocation3 + $0x38] sm:$0xff] (!%p1770_p10) }
 0x357   : > { %1000 = vst.msk [vmem:[#allocation3 + $0x48] sm:$0xff] %vm990_vm4, %v983_v46  ;;  %v1110_v46 = vmul.f32 %v2574_v0, %v1014_v3 }
 0x358   : > { %v959_v23 = vpop.xlane.xlu0 %958 }
 0x359   : > { %v982_v35 = vadd.f32 %v959_v23, %v934_v47  ;;  %v1109_v47 = vmul.f32 %v2576_v4, %v1013_v1  ;;  %v1018_v4 = vld [vmem:[#allocation4 + $0x58] sm:$0xff] }
 0x35b   : > { %999 = vst.msk [vmem:[#allocation3 + $0x40] sm:$0xff] %vm990_vm4, %v982_v35 }
 0x35c   : > { %v965_v2 = vpop.xlane.xlu1 %964 }
 0x35d   : > { %v985_v8 = vadd.f32 %v965_v2, %v937_v12  ;;  %v1015_v12 = vld [vmem:[#allocation4 + $0x40] sm:$0xff]  ;;  %v1112_v2 = vmul.f32 %v2578_v52, %v1016_v37 }
 0x35e   : > { %v1111_v14 = vmul.f32 %v2580_v56, %v1015_v12  ;;  %v1020_v56 = vld [vmem:[#allocation4 + $0x68] sm:$0xff] }
 0x35f   : > { %1002 = vst.msk [vmem:[#allocation3 + $0x58] sm:$0xff] %vm990_vm4, %v985_v8 }
 0x360   : > { %v963_v25 = vpop.xlane.xlu0 %962 }
 0x361   : > { %v984_v28 = vadd.f32 %v963_v25, %v936_v57 }
 0x363   : > { %1001 = vst.msk [vmem:[#allocation3 + $0x50] sm:$0xff] %vm990_vm4, %v984_v28  ;;  %v1114_v28 = vmul.f32 %v2582_v10, %v1018_v4 }
 0x364   : > { %v969_v39 = vpop.xlane.xlu1 %968 }
 0x365   : > { %v987_v43 = vadd.f32 %v969_v39, %v939_v16  ;;  %v1113_v16 = vmul.f32 %v2584_v26, %v1017_v38  ;;  %v1022_v26 = vld [vmem:[#allocation4 + $0x78] sm:$0xff] }
 0x367   : > { %1004 = vst.msk [vmem:[#allocation3 + $0x68] sm:$0xff] %vm990_vm4, %v987_v43 }
 0x368   : > { %v967_v29 = vpop.xlane.xlu0 %966 }
 0x369   : > { %v986_v44 = vadd.f32 %v967_v29, %v938_v63  ;;  %v1019_v63 = vld [vmem:[#allocation4 + $0x60] sm:$0xff]  ;;  %v1116_v29 = vmul.f32 %v2586_v11, %v1020_v56 }
 0x36b   : > { %1003 = vst.msk [vmem:[#allocation3 + $0x60] sm:$0xff] %vm990_vm4, %v986_v44  ;;  %v1115_v44 = vmul.f32 %v2589_v27, %v1019_v63  ;;  %v1334_v27 = vld [vmem:[#allocation3 + $0x10] sm:$0xff] (!%p1770_p10) }
 0x36e   : > { %v1345_v6 = vld [vmem:[#allocation3 + $0x68] sm:$0xff] (!%p1770_p10) }
 0x370   : > { %v971_v49 = vpop.xlane.xlu0 %970 }
 0x371   : > { %v988_v30 = vadd.f32 %v971_v49, %v940_v17 }
 0x372   : > { %v1344_v42 = vld [vmem:[#allocation3 + $0x60] sm:$0xff] (!%p1770_p10) }
 0x373   : > { %1005 = vst.msk [vmem:[#allocation3 + $0x70] sm:$0xff] %vm990_vm4, %v988_v30  ;;  %v1021_v30 = vld [vmem:[#allocation4 + $0x70] sm:$0xff] }
 0x374   : > { %v973_v50 = vpop.xlane.xlu1 %972 }
 0x375   : > { %v989_v51 = vadd.f32 %v973_v50, %v941_v7 }
 0x377   : > { %1006 = vst.msk [vmem:[#allocation3 + $0x78] sm:$0xff] %vm990_vm4, %v989_v51 }
 0x378   : > { %v1101_v9 = vpop.permute.xlu0 %1100  ;;  %v1096_v7 = vpop.permute.xlu1 %1095 }
 0x379   : > { %v1118_v50 = vmul.f32 %v1101_v9, %v1022_v26  ;;  %v1117_v51 = vmul.f32 %v1096_v7, %v1021_v30 }
 0x37f   : > { %v1871_v54 = vpop.f32.mrb[0].mxu1 }
 0x380   : > { %v1265_v18 = vadd.f32 %v1871_v54, %v1104_v53  ;;  %v1185_v48 = vpop.f32.mrb[1].mxu1  ;;  %v2183_v54 = vmov (!%p1770_p10), 0  }
 0x381   : > { %v1264_v55 = vadd.f32 %v1185_v48, %v1103_v31  ;;  %v1332_v31 = vld [vmem:[#allocation3] sm:$0xff] (!%p1770_p10)  ;;  %2091 = vset.pattern.permute.xlu1 (!%p1770_p10), %v2183_v54  ;;  %2090 = vset.pattern.permute.xlu0 (!%p1770_p10), %v2183_v54  ;;  %v1333_v48 = vld [vmem:[#allocation3 + $0x8] sm:$0xff] (!%p1770_p10) }
 0x382   : > { %1281 = vst.msk [vmem:[#allocation4 + $0x8] sm:$0xff] %vm472_vm3, %v1265_v18  ;;  %1360 = vperm.xlu1 (!%p1770_p10), %2091, %v1334_v27   ;;  %1350 = vperm.xlu0 (!%p1770_p10), %2090, %v1332_v31   ;;  %v1335_v18 = vld [vmem:[#allocation3 + $0x18] sm:$0xff] (!%p1770_p10) }
 0x383   : > { %1280 = vst.msk [vmem:[#allocation4] sm:$0xff] %vm472_vm3, %v1264_v55  ;;  %v1337_v55 = vld [vmem:[#allocation3 + $0x28] sm:$0xff] (!%p1770_p10) }
 0x386   : > { %1365 = vperm.xlu1 (!%p1770_p10), %2091, %v1335_v18   ;;  %1355 = vperm.xlu0 (!%p1770_p10), %2090, %v1333_v48  }
 0x387   : > { %v1874_v20 = vpop.f32.mrb[2].mxu1 }
 0x388   : > { %v1267_v60 = vadd.f32 %v1874_v20, %v1106_v32  ;;  %v1195_v33 = vpop.f32.mrb[3].mxu1  ;;  %v1338_v32 = vld [vmem:[#allocation3 + $0x30] sm:$0xff] (!%p1770_p10)  ;;  %v1340_v20 = vld [vmem:[#allocation3 + $0x40] sm:$0xff] (!%p1770_p10) }
 0x389   : > { %v1266_v24 = vadd.f32 %v1195_v33, %v1105_v62  ;;  %v1341_v62 = vld [vmem:[#allocation3 + $0x48] sm:$0xff] (!%p1770_p10)  ;;  %v1342_v33 = vld [vmem:[#allocation3 + $0x50] sm:$0xff] (!%p1770_p10) }
 0x38a   : > { %1283 = vst.msk [vmem:[#allocation4 + $0x18] sm:$0xff] %vm472_vm3, %v1267_v60  ;;  %1375 = vperm.xlu1 (!%p1770_p10), %2091, %v1337_v55   ;;  %1370 = vperm.xlu0 (!%p1770_p10), %2090, %v1336_v59   ;;  %v1343_v60 = vld [vmem:[#allocation3 + $0x58] sm:$0xff] (!%p1770_p10) }
 0x38b   : > { %1282 = vst.msk [vmem:[#allocation4 + $0x10] sm:$0xff] %vm472_vm3, %v1266_v24  ;;  %v2184_v24 = vmov (!%p1770_p10), 0.0|0.0  }
 0x38c   : > { %1928 = vmatprep.subr.bf16.mxu0 (!%p1770_p10), %v2184_v24 }
 0x38e   : > { %1385 = vperm.xlu1 (!%p1770_p10), %2091, %v1339_v5   ;;  %1380 = vperm.xlu0 (!%p1770_p10), %2090, %v1338_v32  }
 0x38f   : > { %v1877_v22 = vpop.f32.mrb[4].mxu1 }
 0x390   : > { %v1269_v15 = vadd.f32 %v1877_v22, %v1108_v61  ;;  %v1205_v34 = vpop.f32.mrb[5].mxu1  ;;  %v1347_v61 = vld [vmem:[#allocation3 + $0x78] sm:$0xff] (!%p1770_p10)  ;;  %v1461_v22 = vld [vmem:[%s2718_s5] sm:$0xff] (!%p1770_p10) }
 0x391   : > { %v1268_v40 = vadd.f32 %v1205_v34, %v1107_v21  ;;  %v1346_v21 = vld [vmem:[#allocation3 + $0x70] sm:$0xff] (!%p1770_p10) }
 0x392   : > { %1285 = vst.msk [vmem:[#allocation4 + $0x28] sm:$0xff] %vm472_vm3, %v1269_v15  ;;  %1395 = vperm.xlu1 (!%p1770_p10), %2091, %v1341_v62   ;;  %1390 = vperm.xlu0 (!%p1770_p10), %2090, %v1340_v20   ;;  %v2186_v15 = vmov (!%p1770_p10), 0.0  }
 0x393   : > { %1284 = vst.msk [vmem:[#allocation4 + $0x20] sm:$0xff] %vm472_vm3, %v1268_v40  ;;  %1925 = vmatprep.mubr.msk.f32.mxu0 (!%p1770_p10), %vm2185_vm5, %v2186_v15 }
 0x396   : > { %1405 = vperm.xlu1 (!%p1770_p10), %2091, %v1343_v60   ;;  %1400 = vperm.xlu0 (!%p1770_p10), %2090, %v1342_v33  }
 0x397   : > { %v1880_v23 = vpop.f32.mrb[6].mxu1 }
 0x398   : > { %v1271_v36 = vadd.f32 %v1880_v23, %v1110_v46  ;;  %v1215_v35 = vpop.f32.mrb[7].mxu1  ;;  %v1316_v23 = vld [vmem:[#allocation4] sm:$0xff] (!%p1770_p10) }
 0x399   : > { %v1270_v58 = vadd.f32 %v1215_v35, %v1109_v47  ;;  %v1321_v56 = vld [vmem:[#allocation4 + $0x28] sm:$0xff] (!%p1770_p10) }
 0x39a   : > { %1287 = vst.msk [vmem:[#allocation4 + $0x38] sm:$0xff] %vm472_vm3, %v1271_v36  ;;  %1415 = vperm.xlu1 (!%p1770_p10), %2091, %v1345_v6   ;;  %1410 = vperm.xlu0 (!%p1770_p10), %2090, %v1344_v42   ;;  %v1317_v36 = vld [vmem:[#allocation4 + $0x8] sm:$0xff] (!%p1770_p10) }
 0x39b   : > { %1286 = vst.msk [vmem:[#allocation4 + $0x30] sm:$0xff] %vm472_vm3, %v1270_v58 }
 0x39e   : > { %1425 = vperm.xlu1 (!%p1770_p10), %2091, %v1347_v61   ;;  %1420 = vperm.xlu0 (!%p1770_p10), %2090, %v1346_v21  }
 0x39f   : > { %v1883_v8 = vpop.f32.mrb[8].mxu1 }
 0x3a0   : > { %v1273_v57 = vadd.f32 %v1883_v8, %v1112_v2  ;;  %v1225_v25 = vpop.f32.mrb[9].mxu1 }
 0x3a1   : > { %v1272_v0 = vadd.f32 %v1225_v25, %v1111_v14  ;;  %v1318_v25 = vld [vmem:[#allocation4 + $0x10] sm:$0xff] (!%p1770_p10)  ;;  %v1323_v9 = vld [vmem:[#allocation4 + $0x38] sm:$0xff] (!%p1770_p10) }
 0x3a2   : > { %1289 = vst.msk [vmem:[#allocation4 + $0x48] sm:$0xff] %vm472_vm3, %v1273_v57  ;;  %1464 = vperm.xlu0 (!%p1770_p10), %2090, %v1461_v22   ;;  %v1322_v26 = vld [vmem:[#allocation4 + $0x30] sm:$0xff] (!%p1770_p10) }
 0x3a3   : > { %1288 = vst.msk [vmem:[#allocation4 + $0x40] sm:$0xff] %vm472_vm3, %v1272_v0  ;;  %v1319_v0 = vld [vmem:[#allocation4 + $0x18] sm:$0xff] (!%p1770_p10) }
 0x3a7   : > { %v1886_v39 = vpop.f32.mrb[10].mxu1 }
 0x3a8   : > { %v1275_v41 = vadd.f32 %v1886_v39, %v1114_v28  ;;  %v1235_v43 = vpop.f32.mrb[11].mxu1 }
 0x3a9   : > { %v1274_v52 = vadd.f32 %v1235_v43, %v1113_v16  ;;  %v1325_v27 = vld [vmem:[#allocation4 + $0x48] sm:$0xff] (!%p1770_p10) }
 0x3aa   : > { %1291 = vst.msk [vmem:[#allocation4 + $0x58] sm:$0xff] %vm472_vm3, %v1275_v41 }
 0x3ab   : > { %1290 = vst.msk [vmem:[#allocation4 + $0x50] sm:$0xff] %vm472_vm3, %v1274_v52  ;;  %v1320_v52 = vld [vmem:[#allocation4 + $0x20] sm:$0xff] (!%p1770_p10) }
 0x3af   : > { %v1889_v45 = vpop.f32.mrb[12].mxu1 }
 0x3b0   : > { %v1277_v17 = vadd.f32 %v1889_v45, %v1116_v29  ;;  %v1245_v49 = vpop.f32.mrb[13].mxu1 }
 0x3b1   : > { %v1276_v10 = vadd.f32 %v1245_v49, %v1115_v44  ;;  %v1327_v62 = vld [vmem:[#allocation4 + $0x58] sm:$0xff] (!%p1770_p10) }
 0x3b2   : > { %1293 = vst.msk [vmem:[#allocation4 + $0x68] sm:$0xff] %vm472_vm3, %v1277_v17  ;;  %v1326_v32 = vld [vmem:[#allocation4 + $0x50] sm:$0xff] (!%p1770_p10) }
 0x3b3   : > { %1292 = vst.msk [vmem:[#allocation4 + $0x60] sm:$0xff] %vm472_vm3, %v1276_v10 }
 0x3b8   : > { %1315 = sbr.rel (%p1770_p10) target bundleno = 1325 (0x52d), region = 52 }
 0x3b9   : > { %v1329_v15 = vld [vmem:[#allocation4 + $0x68] sm:$0xff] (!%p1770_p10) }
 0x3ba   : > { %v1892_v13 = vpop.f32.mrb[14].mxu1  ;;  %v1328_v22 = vld [vmem:[#allocation4 + $0x60] sm:$0xff] (!%p1770_p10) }
 0x3bb   : > { %v1279_v19 = vadd.f32 %v1892_v13, %v1118_v50  ;;  %v1255_v53 = vpop.f32.mrb[15].mxu1 }
 0x3bc   : > { %v1278_v11 = vadd.f32 %v1255_v53, %v1117_v51 }
 0x3bd   : > { %1295 = vst.msk [vmem:[#allocation4 + $0x78] sm:$0xff] %vm472_vm3, %v1279_v19 }
 0x3be   : > { %1294 = vst.msk [vmem:[#allocation4 + $0x70] sm:$0xff] %vm472_vm3, %v1278_v11  ;;  %v1324_v11 = vld [vmem:[#allocation4 + $0x40] sm:$0xff] (!%p1770_p10) }
 0x401   : > { %v1351_v34 = vpop.permute.xlu0 %1350  ;;  %v1361_v40 = vpop.permute.xlu1 %1360 }
 0x402   : > { %2092 = vrcp.f32 %v1351_v34 }
 0x405   : > { %v1356_v3 = vpop.permute.xlu0 %1355  ;;  %v1366_v1 = vpop.permute.xlu1 %1365 }
 0x406   : > { %2094 = vrcp.f32 %v1356_v3 }
 0x407   : > { %2096 = vrcp.f32 %v1361_v40 }
 0x408   : > { %2098 = vrcp.f32 %v1366_v1 }
 0x409   : > { %v1376_v47 = vpop.permute.xlu1 %1375  ;;  %v1371_v35 = vpop.permute.xlu0 %1370 }
 0x40a   : > { %2100 = vrcp.f32 %v1376_v47  ;;  %v1330_v47 = vld [vmem:[#allocation4 + $0x70] sm:$0xff] }
 0x40b   : > { %2102 = vrcp.f32 %v1371_v35 }
 0x40c   : > { %v2093_v46 = vpop.eup %2092 }
 0x40d   : > { %v1429_v37 = vmul.f32 %v2093_v46, %v1316_v23  ;;  %v1386_v4 = vpop.permute.xlu1 %1385  ;;  %v1381_v38 = vpop.permute.xlu0 %1380  ;;  %v1331_v23 = vld [vmem:[#allocation4 + $0x78] sm:$0xff] }
 0x40e   : > { %2104 = vrcp.f32 %v1386_v4 }
 0x40f   : > { %2106 = vrcp.f32 %v1381_v38 }
 0x410   : > { %v2095_v58 = vpop.eup %2094 }
 0x411   : > { %v1431_v12 = vmul.f32 %v2095_v58, %v1317_v36  ;;  %v2097_v14 = vpop.eup %2096  ;;  %v1396_v63 = vpop.permute.xlu1 %1395 }
 0x412   : > { %v2099_v57 = vpop.eup %2098  ;;  %v1433_v28 = vmul.f32 %v2097_v14, %v1318_v25  ;;  %v1391_v29 = vpop.permute.xlu0 %1390  ;;  %2108 = vrcp.f32 %v1396_v63 }
 0x413   : > { %v1929_v8 = vpack.c.bf16 %v1431_v12, %v1429_v37  ;;  %v1435_v16 = vmul.f32 %v2099_v57, %v1319_v0  ;;  %2110 = vrcp.f32 %v1391_v29  ;;  %v1460_v37 = vld [vmem:[%s2717_s4] sm:$0xff] }
 0x414   : > { %v2101_v39 = vpop.eup %2100 }
 0x415   : > { %1931 = vmatpush3.bf16.xpose.msk.msra.mxu0 %vm2659_vm6, %v1929_v8  ;;  %v1933_v41 = vpack.c.bf16 %v1435_v16, %v1433_v28  ;;  %v2103_v43 = vpop.eup %2102  ;;  %v1439_v45 = vmul.f32 %v2101_v39, %v1321_v56  ;;  %v1406_v30 = vpop.permute.xlu1 %1405  ;;  %v1588_v8 = vld [vmem:[%s2275_s16] sm:$0xff] }
 0x416   : > { %1932 = vmatprep.subr.bf16.mxu0 %v2184_v24  ;;  %v1437_v44 = vmul.f32 %v2103_v43, %v1320_v52  ;;  %v1401_v7 = vpop.permute.xlu0 %1400  ;;  %2112 = vrcp.f32 %v1406_v30 }
 0x417   : > { %2114 = vrcp.f32 %v1401_v7 }
 0x418   : > { %v2105_v17 = vpop.eup %2104  ;;  %v1937_v49 = vpack.c.bf16 %v1439_v45, %v1437_v44 }
 0x419   : > { %v2107_v10 = vpop.eup %2106  ;;  %v1443_v51 = vmul.f32 %v2105_v17, %v1323_v9  ;;  %v1416_v31 = vpop.permute.xlu1 %1415 }
 0x41a   : > { %v1441_v50 = vmul.f32 %v2107_v10, %v1322_v26  ;;  %v1411_v54 = vpop.permute.xlu0 %1410  ;;  %2116 = vrcp.f32 %v1416_v31 }
 0x41b   : > { %2118 = vrcp.f32 %v1411_v54 }
 0x41c   : > { %v2109_v13 = vpop.eup %2108  ;;  %v1941_v19 = vpack.c.bf16 %v1443_v51, %v1441_v50 }
 0x41d   : > { %1935 = vmatpush3.bf16.xpose.msk.msra.mxu0 %vm2659_vm6, %v1933_v41  ;;  %v2111_v53 = vpop.eup %2110  ;;  %v1447_v48 = vmul.f32 %v2109_v13, %v1325_v27  ;;  %v1426_v20 = vpop.permute.xlu1 %1425 }
 0x41e   : > { %1936 = vmatprep.subr.bf16.mxu0 %v2184_v24  ;;  %v1445_v18 = vmul.f32 %v2111_v53, %v1324_v11  ;;  %v1421_v60 = vpop.permute.xlu0 %1420  ;;  %2120 = vrcp.f32 %v1426_v20 }
 0x41f   : > { %2122 = vrcp.f32 %v1421_v60 }
 0x420   : > { %v2113_v55 = vpop.eup %2112  ;;  %v1945_v59 = vpack.c.bf16 %v1447_v48, %v1445_v18 }
 0x421   : > { %v2115_v5 = vpop.eup %2114  ;;  %v1451_v6 = vmul.f32 %v2113_v55, %v1327_v62 }
 0x422   : > { %v1449_v33 = vmul.f32 %v2115_v5, %v1326_v32  ;;  %v1465_v12 = vpop.permute.xlu0 %1464 }
 0x424   : > { %v2117_v42 = vpop.eup %2116  ;;  %v1949_v61 = vpack.c.bf16 %v1451_v6, %v1449_v33 }
 0x425   : > { %1939 = vmatpush3.bf16.xpose.msk.msra.mxu0 %vm2659_vm6, %v1937_v49  ;;  %v2119_v21 = vpop.eup %2118  ;;  %v1455_v40 = vmul.f32 %v2117_v42, %v1329_v15 }
 0x426   : > { %1940 = vmatprep.subr.bf16.mxu0 %v2184_v24  ;;  %v1453_v34 = vmul.f32 %v2119_v21, %v1328_v22 }
 0x428   : > { %v2121_v3 = vpop.eup %2120  ;;  %v1953_v1 = vpack.c.bf16 %v1455_v40, %v1453_v34 }
 0x429   : > { %v2123_v46 = vpop.eup %2122  ;;  %v1459_v35 = vmul.f32 %v2121_v3, %v1331_v23 }
 0x42a   : > { %v1457_v36 = vmul.f32 %v2123_v46, %v1330_v47 }
 0x42c   : > { %v1957_v58 = vpack.c.bf16 %v1459_v35, %v1457_v36 }
 0x42d   : > { %1943 = vmatpush3.bf16.xpose.msk.msra.mxu0 %vm2659_vm6, %v1941_v19 }
 0x42e   : > { %1944 = vmatprep.subr.bf16.mxu0 %v2184_v24 }
 0x435   : > { %1947 = vmatpush3.bf16.xpose.msk.msra.mxu0 %vm2659_vm6, %v1945_v59 }
 0x436   : > { %1948 = vmatprep.subr.bf16.mxu0 %v2184_v24 }
 0x43d   : > { %1951 = vmatpush3.bf16.xpose.msk.msra.mxu0 %vm2659_vm6, %v1949_v61 }
 0x43e   : > { %1952 = vmatprep.subr.bf16.mxu0 %v2184_v24 }
 0x445   : > { %1955 = vmatpush3.bf16.xpose.msk.msra.mxu0 %vm2659_vm6, %v1953_v1 }
 0x446   : > { %1956 = vmatprep.subr.bf16.mxu0 %v2184_v24 }
 0x44d   : > { %1959 = vmatpush3.bf16.xpose.msk.msra.mxu0 %vm2659_vm6, %v1957_v58 }
 0x454   : > { %1926 = vmatmul.mubr.msk.f32.vlgmr.msra.gmra.mrb[0].mxu0 %vm472_vm3, %v1460_v37 }
 0x527   : > { %v1584_v14 = vpop.f32.mrb[0].mxu0 }
 0x528   : > { %v1585_v57 = vadd.f32 %v1584_v14, %v1465_v12  ;;  %v1927_v25 = vpop.f32.mrb[1].mxu0 }
 0x52a   : > { %v1589_v0 = vadd.f32 %v1588_v8, %v1585_v57 }
 0x52c   : > { %1590 = vst [vmem:[%s2281_s20] sm:$0xff] %v1589_v0 }
 0x52d PF: > { %s16_s27 = sadd.s32 1, %s2178_s27   ;;  %s2724_s10 = sld [smem:[#allocation5_spill]] }
 0x52e   : > { %p13_p11 = scmp.ge.s32.totalorder %s16_s27, 10   ;;  %s2725_s13 = sld [smem:[#allocation6_spill]] }
 0x52f   : > { %s2726_s21 = smov %s2166_s24  ;;  %s2727_s22 = smov %s2170_s25 }
 0x530   : > { %s2728_s23 = smov %s2174_s26  ;;  %s2729_s24 = smov %s2733_s28 }
 0x531   :  { %15 = sbr.rel (!%p13_p11) target bundleno = 4 (0x4), region = 91 }
 0x533   : > { %s2730_s25 = smov %s2724_s10 }
 0x534   : > { %s2731_s26 = smov %s2725_s13 }

</bundles_post_ra>
